<compile_context>
chip_gen: v5e
topology: v5e:2x2
jax: 0.10.0
libtpu: 0.0.40
codegen_flags: <defaults>
</compile_context>

<pallas_src>
import math

import jax
import jax.numpy as jnp
from jax.experimental import pallas as pl
from jax.experimental.pallas import tpu as pltpu

# ----------------------- scaled-down configuration -------------------------
B = 2                       # batch
H_IN, W_IN = 24, 176        # EEG (electrodes, time samples)
KW, PAD_W = 36, 2           # conv1: kernel/stride (1, 36), padding (0, 2)
C1 = 8                      # conv1 out channels      (256 in the original)
PH = 8                      # ViT patch height, patch_size = (8, 1)
D = 32                      # ViT hidden size         (768 in the original)
NH = 4                      # attention heads
HD = D // NH                # head dim
MLP = 4 * D                 # MLP intermediate size
LAYERS = 2                  # encoder layers          (12 in the original)
HC = 64                     # classifier hidden       (1000 in the original)
NCLS = 2                    # output classes
BN_EPS = 0.0                # nn.BatchNorm2d(256, False) -> eps = False == 0.0
LN_EPS = 1e-12              # ViTConfig.layer_norm_eps

WP = (W_IN + 2 * PAD_W) // KW     # conv1 output width  (= 5)
HP = H_IN // PH                   # patch rows          (= 3)
NP = HP * WP                      # number of patches   (= 15)
T = NP + 1                        # tokens incl. CLS    (= 16)
DG = D // C1                      # out channels per group in grouped conv

# Matmul input dtype.  Keep f32 for bit-faithful semantics; set to
# jnp.bfloat16 on v6e/v7x for 2x MXU throughput + halved VMEM/HBM traffic
# (accumulation stays f32 via preferred_element_type).
MM_DTYPE = jnp.float32


# ----------------------------- kernel helpers -------------------------------
def _mm(a, b):
    return jnp.dot(a.astype(MM_DTYPE), b.astype(MM_DTYPE),
                   preferred_element_type=jnp.float32)


def _mm_nt(a, b):
    # a @ b.T (contract last dims), no explicit transpose materialized.
    return jax.lax.dot_general(
        a.astype(MM_DTYPE), b.astype(MM_DTYPE),
        dimension_numbers=(((1,), (1,)), ((), ())),
        preferred_element_type=jnp.float32)


def _layer_norm(x, g, b, eps):
    mu = jnp.mean(x, axis=-1, keepdims=True)
    xc = x - mu
    var = jnp.mean(xc * xc, axis=-1, keepdims=True)
    return xc * jax.lax.rsqrt(var + eps) * g + b


def _erf(x):
    # Abramowitz & Stegun 7.1.26 (|err| <= 1.5e-7: at f32 precision).
    a1, a2, a3, a4, a5 = 0.254829592, -0.284496736, 1.421413741, -1.453152027, 1.061405429
    p = 0.3275911
    s = jnp.where(x >= 0.0, 1.0, -1.0)
    z = jnp.abs(x)
    t = 1.0 / (1.0 + p * z)
    y = 1.0 - (((((a5 * t + a4) * t + a3) * t + a2) * t + a1) * t) * jnp.exp(-z * z)
    return s * y


def _gelu_exact(x):
    # HF ViT uses exact (erf-based) GELU; keep in f32 (v5e has no bf16 VPU/EUP).
    return 0.5 * x * (1.0 + _erf(x * (1.0 / math.sqrt(2.0))))


# ------------------------------- kernels -------------------------------------
def embed_kernel(xq_ref, w1_ref, sc_ref, sh_ref, wb_ref, pb_ref, o_ref):
    # conv1 (kernel==stride, width-only) + eval-mode BatchNorm + grouped
    # patch-embedding conv, as two chained matmuls on width/height patches.
    z = _mm(xq_ref[...], w1_ref[...])                 # (B*NP, C1*PH)
    z = z * sc_ref[...] + sh_ref[...]                 # fused BatchNorm2d(C1, eps=0)
    o_ref[...] = _mm(z, wb_ref[...]) + pb_ref[...]    # (B*NP, D) patch embeddings


def encoder_head_kernel(seq_ref,
                        ln1g_ref, ln1b_ref, wqkv_ref, bqkv_ref, wo_ref, bo_ref,
                        ln2g_ref, ln2b_ref, w1_ref, b1_ref, w2_ref, b2_ref,
                        hg_ref, hb_ref, cw1_ref, cb1_ref, cw2_ref, cb2_ref,
                        logits_ref, seq_sc):
    # grid = (batch, layer).  `seq_sc` keeps this batch element's token
    # sequence resident in VMEM across the whole layer loop.
    layer = pl.program_id(1)

    @pl.when(layer == 0)
    def _():
        seq_sc[...] = seq_ref[...]                    # load embeddings once per batch

    x = seq_sc[...]                                   # (T, D)

    # ---- self-attention block (pre-norm), fused QKV, dropout p=0.0 ----
    h = _layer_norm(x, ln1g_ref[...], ln1b_ref[...], LN_EPS)
    qkv = _mm(h, wqkv_ref[...]) + bqkv_ref[...]       # (T, 3D)
    inv_sqrt_hd = 1.0 / math.sqrt(HD)
    ctx = []
    for hi in range(NH):                              # static unroll over heads
        qh = qkv[:, hi * HD:(hi + 1) * HD]
        kh = qkv[:, D + hi * HD:D + (hi + 1) * HD]
        vh = qkv[:, 2 * D + hi * HD:2 * D + (hi + 1) * HD]
        s = _mm_nt(qh, kh) * inv_sqrt_hd              # (T, T)
        s = s - jnp.max(s, axis=-1, keepdims=True)
        p = jnp.exp(s)
        p = p * pl.reciprocal(jnp.sum(p, axis=-1, keepdims=True), approx=True)
        ctx.append(_mm(p, vh))                        # (T, HD)
    ctx = jnp.concatenate(ctx, axis=-1)               # (T, D): single Wo matmul
    x = x + _mm(ctx, wo_ref[...]) + bo_ref[...]

    # ---- MLP block (pre-norm), exact GELU ----
    h2 = _layer_norm(x, ln2g_ref[...], ln2b_ref[...], LN_EPS)
    m = _gelu_exact(_mm(h2, w1_ref[...]) + b1_ref[...])
    x = x + _mm(m, w2_ref[...]) + b2_ref[...]

    seq_sc[...] = x

    # ---- final LayerNorm + classifier on the resident CLS row (last layer) ----
    @pl.when(layer == pl.num_programs(1) - 1)
    def _():
        cls = x[0:1, :]                               # (1, D)
        hh = _layer_norm(cls, hg_ref[...], hb_ref[...], LN_EPS)
        hh = _mm(hh, cw1_ref[...]) + cb1_ref[...]
        # classifier Dropout(p=0.1) is identity at inference.
        logits_ref[...] = _mm(hh, cw2_ref[...]) + cb2_ref[...]


# --------------------------- pallas_call wrappers ----------------------------
_VMEM = pl.BlockSpec(memory_space=pltpu.MemorySpace.VMEM)


def embed(xq, p):
    return pl.pallas_call(
        embed_kernel,
        out_shape=jax.ShapeDtypeStruct((B * NP, D), jnp.float32),
        in_specs=[_VMEM] * 6,
        out_specs=_VMEM,
    )(xq, p['w1big'], p['bn_scale'], p['bn_shift'], p['w_block'], p['patch_b'])


def encoder_head(seq, p):
    layer_args = (p['ln1_g'], p['ln1_b'], p['wqkv'], p['bqkv'], p['wo'], p['bo'],
                  p['ln2_g'], p['ln2_b'], p['w1'], p['b1'], p['w2'], p['b2'])
    head_args = (p['ln_g'], p['ln_b'], p['cls_w1'], p['cls_b1'],
                 p['cls_w2'], p['cls_b2'])

    def layer_spec(arr):                              # (LAYERS, r, c) -> block (r, c)
        return pl.BlockSpec((None,) + arr.shape[1:], lambda b, l: (l, 0, 0))

    def shared_spec(arr):                             # same block for every step
        return pl.BlockSpec(arr.shape, lambda b, l, _n=arr.ndim: (0,) * _n)

    in_specs = ([pl.BlockSpec((None, T, D), lambda b, l: (b, 0, 0))]
                + [layer_spec(a) for a in layer_args]
                + [shared_spec(a) for a in head_args])

    logits = pl.pallas_call(
        encoder_head_kernel,
        out_shape=jax.ShapeDtypeStruct((B, 1, NCLS), jnp.float32),
        grid=(B, LAYERS),
        in_specs=in_specs,
        out_specs=pl.BlockSpec((None, 1, NCLS), lambda b, l: (b, 0, 0)),
        scratch_shapes=[pltpu.VMEM((T, D), jnp.float32)],
        compiler_params=pltpu.CompilerParams(
            dimension_semantics=("parallel", "arbitrary")),
        # TODO(synk): at full model scale (D=768, MLP=3072, 12 layers) the
        # whole-layer-weights-in-VMEM blocks must be tiled (e.g. grid over the
        # MLP intermediate dim) and vmem_limit_bytes raised explicitly.
    )(seq, *layer_args, *head_args)
    return logits[:, 0, :]                            # (B, NCLS)


# ----------------------------- parameters ------------------------------------
def init_params(key):
    # Deterministic in-script init.
    # TODO(synk): pretrained HF checkpoint loading has no in-script equivalent.
    keys = iter(jax.random.split(key, 64))

    def nrm(shape, scale=0.02):
        return scale * jax.random.normal(next(keys), shape, jnp.float32)

    params = {
        # conv1.weight is (C1,1,1,KW) in PyTorch; stored here transposed (KW,C1).
        'conv1_w': nrm((KW, C1)),
        'bn_gamma': jnp.ones((C1,), jnp.float32),
        'bn_beta': jnp.zeros((C1,), jnp.float32),
        'bn_mean': jnp.zeros((C1,), jnp.float32),   # eval-mode running stats
        'bn_var': jnp.ones((C1,), jnp.float32),
        # grouped projection conv weight (D,1,PH,1) in PyTorch; stored (D,PH).
        'patch_w': nrm((D, PH)),
        'patch_b': nrm((D,)),
        'cls_token': nrm((1, 1, D)),
        'pos_emb': nrm((1, T, D)),
        'layers': [],
        'ln_g': jnp.ones((1, D), jnp.float32),
        'ln_b': jnp.zeros((1, D), jnp.float32),
        'cls_w1': nrm((D, HC)),
        'cls_b1': jnp.zeros((1, HC), jnp.float32),
        'cls_w2': nrm((HC, NCLS)),
        'cls_b2': jnp.zeros((1, NCLS), jnp.float32),
    }
    for _ in range(LAYERS):
        params['layers'].append((
            jnp.ones((1, D), jnp.float32), jnp.zeros((1, D), jnp.float32),   # ln1
            nrm((D, D)), jnp.zeros((1, D), jnp.float32),                     # Wq, bq
            nrm((D, D)), jnp.zeros((1, D), jnp.float32),                     # Wk, bk
            nrm((D, D)), jnp.zeros((1, D), jnp.float32),                     # Wv, bv
            nrm((D, D)), jnp.zeros((1, D), jnp.float32),                     # Wo, bo
            jnp.ones((1, D), jnp.float32), jnp.zeros((1, D), jnp.float32),   # ln2
            nrm((D, MLP)), jnp.zeros((1, MLP), jnp.float32),                 # fc1
            nrm((MLP, D)), jnp.zeros((1, D), jnp.float32),                   # fc2
        ))
    return params


def pack_params(params):
    """One-time packing of parameters into kernel-ready layouts (hoisted out
    of the per-inference hot path)."""
    # conv1 + BatchNorm fused scale/shift, laid out per (channel, patch-row).
    scale = params['bn_gamma'] * jax.lax.rsqrt(params['bn_var'] + BN_EPS)
    shift = params['bn_beta'] - params['bn_mean'] * scale
    bn_scale = jnp.repeat(scale, PH).reshape(1, C1 * PH)
    bn_shift = jnp.repeat(shift, PH).reshape(1, C1 * PH)

    # conv1 as a block-diagonal matmul over (patch-row, kernel-width) columns:
    # w1big[ph*KW+kw, c*PH+ph2] = conv1_w[kw, c] * (ph == ph2)
    eye_ph = jnp.eye(PH, dtype=jnp.float32)
    w1big = (eye_ph[:, None, None, :] *
             params['conv1_w'][None, :, :, None]).reshape(PH * KW, C1 * PH)

    # grouped patch-embed conv as a block-diagonal dense layer:
    # w_block[c*PH+ph, d] = patch_w[d, ph] * (c == d // DG)
    group_mask = (jnp.arange(C1)[:, None] ==
                  (jnp.arange(D) // DG)[None, :]).astype(jnp.float32)   # (C1, D)
    w_block = (group_mask[:, None, :] *
               params['patch_w'].T[None, :, :]).reshape(C1 * PH, D)

    layers = params['layers']
    stack = lambda i: jnp.stack([lp[i] for lp in layers], axis=0)
    wqkv = jnp.stack([jnp.concatenate([lp[2], lp[4], lp[6]], axis=1)
                      for lp in layers], axis=0)                         # (L, D, 3D)
    bqkv = jnp.stack([jnp.concatenate([lp[3], lp[5], lp[7]], axis=1)
                      for lp in layers], axis=0)                         # (L, 1, 3D)

    return {
        'w1big': w1big, 'bn_scale': bn_scale, 'bn_shift': bn_shift,
        'w_block': w_block, 'patch_b': params['patch_b'].reshape(1, D),
        'cls_token': params['cls_token'], 'pos_emb': params['pos_emb'],
        'ln1_g': stack(0), 'ln1_b': stack(1),
        'wqkv': wqkv, 'bqkv': bqkv,
        'wo': stack(8), 'bo': stack(9),
        'ln2_g': stack(10), 'ln2_b': stack(11),
        'w1': stack(12), 'b1': stack(13),
        'w2': stack(14), 'b2': stack(15),
        'ln_g': params['ln_g'], 'ln_b': params['ln_b'],
        'cls_w1': params['cls_w1'], 'cls_b1': params['cls_b1'],
        'cls_w2': params['cls_w2'], 'cls_b2': params['cls_b2'],
    }


# ------------------------------- forward -------------------------------------
@jax.jit
def eegvit_forward(packed, x):
    # Re-arrange the padded input into (B*NP, PH*KW) width/height patches so
    # conv1 + BN + grouped patch-embed become two matmuls in one kernel.
    xpad = jnp.pad(x[:, 0, :, :], ((0, 0), (0, 0), (PAD_W, PAD_W)))   # (B, H, W+4)
    xq = (xpad.reshape(B, HP, PH, WP, KW)
              .transpose(0, 1, 3, 2, 4)
              .reshape(B * NP, PH * KW))

    tokens = embed(xq, packed).reshape(B, NP, D)                      # (B, NP, D)

    # ViT embeddings: [CLS] + patches, + position embeddings (dropout p=0.0).
    cls = jnp.broadcast_to(packed['cls_token'], (B, 1, D))
    seq = jnp.concatenate([cls, tokens], axis=1) + packed['pos_emb']  # (B, T, D)

    # Fused encoder stack + final LayerNorm + classifier head (single kernel).
    return encoder_head(seq, packed)                                  # (B, NCLS)


# --------------------------------- main ---------------------------------------
if __name__ == "__main__":
    key = jax.random.PRNGKey(0)
    pkey, xkey = jax.random.split(key)
    params = init_params(pkey)
    packed = pack_params(params)
    x = jax.random.normal(xkey, (B, 1, H_IN, W_IN), jnp.float32)   # NCHW like PyTorch
    out = eegvit_forward(packed, x)
    jax.block_until_ready(out)
    assert out.shape == (B, NCLS) and out.dtype == jnp.float32
    print("KERNEL_OK")
</pallas_src>

<mosaic_0001>
module attributes {stable_mosaic.version = 11 : i64} {
  func.func @embed_kernel(%arg0: memref<30x288xf32, #tpu.memory_space<vmem>>, %arg1: memref<288x64xf32, #tpu.memory_space<vmem>>, %arg2: memref<1x64xf32, #tpu.memory_space<vmem>>, %arg3: memref<1x64xf32, #tpu.memory_space<vmem>>, %arg4: memref<64x32xf32, #tpu.memory_space<vmem>>, %arg5: memref<1x32xf32, #tpu.memory_space<vmem>>, %arg6: memref<30x32xf32, #tpu.memory_space<vmem>>) attributes {dimension_semantics = [], scalar_prefetch = 0 : i64, scratch_operands = 0 : i64, tpu.core_type = #tpu.core_type<tc>} {
    %c0 = arith.constant 0 : index
    %c0_0 = arith.constant 0 : index
    %0 = vector.load %arg0[%c0, %c0_0] : memref<30x288xf32, #tpu.memory_space<vmem>>, vector<30x288xf32>
    %c0_1 = arith.constant 0 : index
    %c0_2 = arith.constant 0 : index
    %1 = vector.load %arg1[%c0_1, %c0_2] : memref<288x64xf32, #tpu.memory_space<vmem>>, vector<288x64xf32>
    %cst = arith.constant dense<0.000000e+00> : vector<30x64xf32>
    %2 = tpu.matmul %0, %1, %cst {dimension_numbers = #tpu.dot_dimension_numbers<[1], [0], [0], [1], [0, 0, 1, 1], [], []>} : vector<30x288xf32>, vector<288x64xf32>, vector<30x64xf32> -> vector<30x64xf32>
    %c0_3 = arith.constant 0 : index
    %c0_4 = arith.constant 0 : index
    %3 = vector.load %arg2[%c0_3, %c0_4] : memref<1x64xf32, #tpu.memory_space<vmem>>, vector<1x64xf32>
    %4 = vector.broadcast %3 : vector<1x64xf32> to vector<30x64xf32>
    %5 = arith.mulf %2, %4 : vector<30x64xf32>
    %c0_5 = arith.constant 0 : index
    %c0_6 = arith.constant 0 : index
    %6 = vector.load %arg3[%c0_5, %c0_6] : memref<1x64xf32, #tpu.memory_space<vmem>>, vector<1x64xf32>
    %7 = vector.broadcast %6 : vector<1x64xf32> to vector<30x64xf32>
    %8 = arith.addf %5, %7 : vector<30x64xf32>
    %c0_7 = arith.constant 0 : index
    %c0_8 = arith.constant 0 : index
    %9 = vector.load %arg4[%c0_7, %c0_8] : memref<64x32xf32, #tpu.memory_space<vmem>>, vector<64x32xf32>
    %cst_9 = arith.constant dense<0.000000e+00> : vector<30x32xf32>
    %10 = tpu.matmul %8, %9, %cst_9 {dimension_numbers = #tpu.dot_dimension_numbers<[1], [0], [0], [1], [0, 0, 1, 1], [], []>} : vector<30x64xf32>, vector<64x32xf32>, vector<30x32xf32> -> vector<30x32xf32>
    %c0_10 = arith.constant 0 : index
    %c0_11 = arith.constant 0 : index
    %11 = vector.load %arg5[%c0_10, %c0_11] : memref<1x32xf32, #tpu.memory_space<vmem>>, vector<1x32xf32>
    %12 = vector.broadcast %11 : vector<1x32xf32> to vector<30x32xf32>
    %13 = arith.addf %10, %12 : vector<30x32xf32>
    %c0_12 = arith.constant 0 : index
    %c0_13 = arith.constant 0 : index
    %14 = vector.load %arg6[%c0_12, %c0_13] : memref<30x32xf32, #tpu.memory_space<vmem>>, vector<30x32xf32>
    tpu.vector_store %arg6[%c0_12, %c0_13], %13 {strides = array<i32>} : memref<30x32xf32, #tpu.memory_space<vmem>>, vector<30x32xf32>,
    return
  }
}

module attributes {stable_mosaic.version = 11 : i64} {
  func.func @encoder_head_kernel(%arg0: i32, %arg1: i32, %arg2: memref<1x16x32xf32, #tpu.memory_space<vmem>>, %arg3: memref<1x1x32xf32, #tpu.memory_space<vmem>>, %arg4: memref<1x1x32xf32, #tpu.memory_space<vmem>>, %arg5: memref<1x32x96xf32, #tpu.memory_space<vmem>>, %arg6: memref<1x1x96xf32, #tpu.memory_space<vmem>>, %arg7: memref<1x32x32xf32, #tpu.memory_space<vmem>>, %arg8: memref<1x1x32xf32, #tpu.memory_space<vmem>>, %arg9: memref<1x1x32xf32, #tpu.memory_space<vmem>>, %arg10: memref<1x1x32xf32, #tpu.memory_space<vmem>>, %arg11: memref<1x32x128xf32, #tpu.memory_space<vmem>>, %arg12: memref<1x1x128xf32, #tpu.memory_space<vmem>>, %arg13: memref<1x128x32xf32, #tpu.memory_space<vmem>>, %arg14: memref<1x1x32xf32, #tpu.memory_space<vmem>>, %arg15: memref<1x32xf32, #tpu.memory_space<vmem>>, %arg16: memref<1x32xf32, #tpu.memory_space<vmem>>, %arg17: memref<32x64xf32, #tpu.memory_space<vmem>>, %arg18: memref<1x64xf32, #tpu.memory_space<vmem>>, %arg19: memref<64x2xf32, #tpu.memory_space<vmem>>, %arg20: memref<1x2xf32, #tpu.memory_space<vmem>>, %arg21: memref<1x1x2xf32, #tpu.memory_space<vmem>>, %arg22: memref<16x32xf32, #tpu.memory_space<vmem>>) attributes {dimension_semantics = [#tpu.dimension_semantics<parallel>, #tpu.dimension_semantics<arbitrary>], iteration_bounds = array<i64: 2, 2>, scalar_prefetch = 0 : i64, scratch_operands = 1 : i64, tpu.core_type = #tpu.core_type<tc>, window_params = [{transform_indices = @transform_0, window_bounds = array<i64: 1, 16, 32>}, {transform_indices = @transform_1, window_bounds = array<i64: 1, 1, 32>}, {transform_indices = @transform_2, window_bounds = array<i64: 1, 1, 32>}, {transform_indices = @transform_3, window_bounds = array<i64: 1, 32, 96>}, {transform_indices = @transform_4, window_bounds = array<i64: 1, 1, 96>}, {transform_indices = @transform_5, window_bounds = array<i64: 1, 32, 32>}, {transform_indices = @transform_6, window_bounds = array<i64: 1, 1, 32>}, {transform_indices = @transform_7, window_bounds = array<i64: 1, 1, 32>}, {transform_indices = @transform_8, window_bounds = array<i64: 1, 1, 32>}, {transform_indices = @transform_9, window_bounds = array<i64: 1, 32, 128>}, {transform_indices = @transform_10, window_bounds = array<i64: 1, 1, 128>}, {transform_indices = @transform_11, window_bounds = array<i64: 1, 128, 32>}, {transform_indices = @transform_12, window_bounds = array<i64: 1, 1, 32>}, {pipeline_mode = #tpu.pipeline_mode<synchronous>, transform_indices = @transform_13, window_bounds = array<i64: 1, 32>}, {pipeline_mode = #tpu.pipeline_mode<synchronous>, transform_indices = @transform_14, window_bounds = array<i64: 1, 32>}, {pipeline_mode = #tpu.pipeline_mode<synchronous>, transform_indices = @transform_15, window_bounds = array<i64: 32, 64>}, {pipeline_mode = #tpu.pipeline_mode<synchronous>, transform_indices = @transform_16, window_bounds = array<i64: 1, 64>}, {pipeline_mode = #tpu.pipeline_mode<synchronous>, transform_indices = @transform_17, window_bounds = array<i64: 64, 2>}, {pipeline_mode = #tpu.pipeline_mode<synchronous>, transform_indices = @transform_18, window_bounds = array<i64: 1, 2>}, {transform_indices = @transform_19, window_bounds = array<i64: 1, 1, 2>}]} {
    %c0_i32 = arith.constant 0 : i32
    %0 = arith.cmpi eq, %arg1, %c0_i32 : i32
    %1 = arith.extui %0 : i1 to i32
    %c0_i32_0 = arith.constant 0 : i32
    %2 = arith.cmpi ne, %1, %c0_i32_0 : i32
    scf.if %2 {
      %c0_90 = arith.constant 0 : index
      %c0_91 = arith.constant 0 : index
      %c0_92 = arith.constant 0 : index
      %196 = vector.load %arg2[%c0_90, %c0_91, %c0_92] : memref<1x16x32xf32, #tpu.memory_space<vmem>>, vector<1x16x32xf32>
      %197 = vector.shape_cast %196 : vector<1x16x32xf32> to vector<16x32xf32>
      %c0_93 = arith.constant 0 : index
      %c0_94 = arith.constant 0 : index
      %198 = vector.load %arg22[%c0_93, %c0_94] : memref<16x32xf32, #tpu.memory_space<vmem>>, vector<16x32xf32>
      tpu.vector_store %arg22[%c0_93, %c0_94], %197 {strides = array<i32>} : memref<16x32xf32, #tpu.memory_space<vmem>>, vector<16x32xf32>,
    } else {
    }
    %c0 = arith.constant 0 : index
    %c0_1 = arith.constant 0 : index
    %3 = vector.load %arg22[%c0, %c0_1] : memref<16x32xf32, #tpu.memory_space<vmem>>, vector<16x32xf32>
    %c0_2 = arith.constant 0 : index
    %c0_3 = arith.constant 0 : index
    %c0_4 = arith.constant 0 : index
    %4 = vector.load %arg3[%c0_2, %c0_3, %c0_4] : memref<1x1x32xf32, #tpu.memory_space<vmem>>, vector<1x1x32xf32>
    %5 = vector.shape_cast %4 : vector<1x1x32xf32> to vector<1x32xf32>
    %c0_5 = arith.constant 0 : index
    %c0_6 = arith.constant 0 : index
    %c0_7 = arith.constant 0 : index
    %6 = vector.load %arg4[%c0_5, %c0_6, %c0_7] : memref<1x1x32xf32, #tpu.memory_space<vmem>>, vector<1x1x32xf32>
    %7 = vector.shape_cast %6 : vector<1x1x32xf32> to vector<1x32xf32>
    %cst = arith.constant dense<0.000000e+00> : vector<16xf32>
    %8 = vector.multi_reduction <add>, %3, %cst [1] : vector<16x32xf32> to vector<16xf32>
    %9 = vector.shape_cast %8 : vector<16xf32> to vector<16x1xf32>
    %cst_8 = arith.constant 3.200000e+01 : f32
    %10 = vector.broadcast %cst_8 : f32 to vector<16x1xf32>
    %11 = arith.divf %9, %10 : vector<16x1xf32>
    %12 = vector.broadcast %11 : vector<16x1xf32> to vector<16x32xf32>
    %13 = arith.subf %3, %12 : vector<16x32xf32>
    %14 = arith.mulf %13, %13 : vector<16x32xf32>
    %cst_9 = arith.constant dense<0.000000e+00> : vector<16xf32>
    %15 = vector.multi_reduction <add>, %14, %cst_9 [1] : vector<16x32xf32> to vector<16xf32>
    %16 = vector.shape_cast %15 : vector<16xf32> to vector<16x1xf32>
    %cst_10 = arith.constant 3.200000e+01 : f32
    %17 = vector.broadcast %cst_10 : f32 to vector<16x1xf32>
    %18 = arith.divf %16, %17 : vector<16x1xf32>
    %cst_11 = arith.constant 9.99999996E-13 : f32
    %19 = vector.broadcast %cst_11 : f32 to vector<16x1xf32>
    %20 = arith.addf %18, %19 : vector<16x1xf32>
    %21 = math.rsqrt %20 : vector<16x1xf32>
    %22 = vector.broadcast %21 : vector<16x1xf32> to vector<16x32xf32>
    %23 = arith.mulf %13, %22 : vector<16x32xf32>
    %24 = vector.broadcast %5 : vector<1x32xf32> to vector<16x32xf32>
    %25 = arith.mulf %23, %24 : vector<16x32xf32>
    %26 = vector.broadcast %7 : vector<1x32xf32> to vector<16x32xf32>
    %27 = arith.addf %25, %26 : vector<16x32xf32>
    %c0_12 = arith.constant 0 : index
    %c0_13 = arith.constant 0 : index
    %c0_14 = arith.constant 0 : index
    %28 = vector.load %arg5[%c0_12, %c0_13, %c0_14] : memref<1x32x96xf32, #tpu.memory_space<vmem>>, vector<1x32x96xf32>
    %29 = vector.shape_cast %28 : vector<1x32x96xf32> to vector<32x96xf32>
    %cst_15 = arith.constant dense<0.000000e+00> : vector<16x96xf32>
    %30 = tpu.matmul %27, %29, %cst_15 {dimension_numbers = #tpu.dot_dimension_numbers<[1], [0], [0], [1], [0, 0, 1, 1], [], []>} : vector<16x32xf32>, vector<32x96xf32>, vector<16x96xf32> -> vector<16x96xf32>
    %c0_16 = arith.constant 0 : index
    %c0_17 = arith.constant 0 : index
    %c0_18 = arith.constant 0 : index
    %31 = vector.load %arg6[%c0_16, %c0_17, %c0_18] : memref<1x1x96xf32, #tpu.memory_space<vmem>>, vector<1x1x96xf32>
    %32 = vector.shape_cast %31 : vector<1x1x96xf32> to vector<1x96xf32>
    %33 = vector.broadcast %32 : vector<1x96xf32> to vector<16x96xf32>
    %34 = arith.addf %30, %33 : vector<16x96xf32>
    %35 = vector.extract_strided_slice %34 {offsets = [0, 0], sizes = [16, 8], strides = [1, 1]} : vector<16x96xf32> to vector<16x8xf32>
    %36 = vector.extract_strided_slice %34 {offsets = [0, 32], sizes = [16, 8], strides = [1, 1]} : vector<16x96xf32> to vector<16x8xf32>
    %37 = vector.extract_strided_slice %34 {offsets = [0, 64], sizes = [16, 8], strides = [1, 1]} : vector<16x96xf32> to vector<16x8xf32>
    %cst_19 = arith.constant dense<0.000000e+00> : vector<16x16xf32>
    %38 = tpu.matmul %35, %36, %cst_19 {dimension_numbers = #tpu.dot_dimension_numbers<[1], [1], [0], [0], [0, 0, 1, 0], [], []>} : vector<16x8xf32>, vector<16x8xf32>, vector<16x16xf32> -> vector<16x16xf32>
    %cst_20 = arith.constant 0.353553385 : f32
    %39 = vector.broadcast %cst_20 : f32 to vector<16x16xf32>
    %40 = arith.mulf %38, %39 : vector<16x16xf32>
    %cst_21 = arith.constant dense<0xFF800000> : vector<16xf32>
    %41 = vector.multi_reduction <maximumf>, %40, %cst_21 [1] : vector<16x16xf32> to vector<16xf32>
    %42 = vector.shape_cast %41 : vector<16xf32> to vector<16x1xf32>
    %43 = vector.broadcast %42 : vector<16x1xf32> to vector<16x16xf32>
    %44 = arith.subf %40, %43 : vector<16x16xf32>
    %45 = math.exp %44 : vector<16x16xf32>
    %cst_22 = arith.constant dense<0.000000e+00> : vector<16xf32>
    %46 = vector.multi_reduction <add>, %45, %cst_22 [1] : vector<16x16xf32> to vector<16xf32>
    %47 = vector.shape_cast %46 : vector<16xf32> to vector<16x1xf32>
    %48 = tpu.reciprocal %47 {approx = true} : vector<16x1xf32> -> vector<16x1xf32>
    %49 = vector.broadcast %48 : vector<16x1xf32> to vector<16x16xf32>
    %50 = arith.mulf %45, %49 : vector<16x16xf32>
    %cst_23 = arith.constant dense<0.000000e+00> : vector<16x8xf32>
    %51 = tpu.matmul %50, %37, %cst_23 {dimension_numbers = #tpu.dot_dimension_numbers<[1], [0], [0], [1], [0, 0, 1, 1], [], []>} : vector<16x16xf32>, vector<16x8xf32>, vector<16x8xf32> -> vector<16x8xf32>
    %52 = vector.extract_strided_slice %34 {offsets = [0, 8], sizes = [16, 8], strides = [1, 1]} : vector<16x96xf32> to vector<16x8xf32>
    %53 = vector.extract_strided_slice %34 {offsets = [0, 40], sizes = [16, 8], strides = [1, 1]} : vector<16x96xf32> to vector<16x8xf32>
    %54 = vector.extract_strided_slice %34 {offsets = [0, 72], sizes = [16, 8], strides = [1, 1]} : vector<16x96xf32> to vector<16x8xf32>
    %cst_24 = arith.constant dense<0.000000e+00> : vector<16x16xf32>
    %55 = tpu.matmul %52, %53, %cst_24 {dimension_numbers = #tpu.dot_dimension_numbers<[1], [1], [0], [0], [0, 0, 1, 0], [], []>} : vector<16x8xf32>, vector<16x8xf32>, vector<16x16xf32> -> vector<16x16xf32>
    %cst_25 = arith.constant 0.353553385 : f32
    %56 = vector.broadcast %cst_25 : f32 to vector<16x16xf32>
    %57 = arith.mulf %55, %56 : vector<16x16xf32>
    %cst_26 = arith.constant dense<0xFF800000> : vector<16xf32>
    %58 = vector.multi_reduction <maximumf>, %57, %cst_26 [1] : vector<16x16xf32> to vector<16xf32>
    %59 = vector.shape_cast %58 : vector<16xf32> to vector<16x1xf32>
    %60 = vector.broadcast %59 : vector<16x1xf32> to vector<16x16xf32>
    %61 = arith.subf %57, %60 : vector<16x16xf32>
    %62 = math.exp %61 : vector<16x16xf32>
    %cst_27 = arith.constant dense<0.000000e+00> : vector<16xf32>
    %63 = vector.multi_reduction <add>, %62, %cst_27 [1] : vector<16x16xf32> to vector<16xf32>
    %64 = vector.shape_cast %63 : vector<16xf32> to vector<16x1xf32>
    %65 = tpu.reciprocal %64 {approx = true} : vector<16x1xf32> -> vector<16x1xf32>
    %66 = vector.broadcast %65 : vector<16x1xf32> to vector<16x16xf32>
    %67 = arith.mulf %62, %66 : vector<16x16xf32>
    %cst_28 = arith.constant dense<0.000000e+00> : vector<16x8xf32>
    %68 = tpu.matmul %67, %54, %cst_28 {dimension_numbers = #tpu.dot_dimension_numbers<[1], [0], [0], [1], [0, 0, 1, 1], [], []>} : vector<16x16xf32>, vector<16x8xf32>, vector<16x8xf32> -> vector<16x8xf32>
    %69 = vector.extract_strided_slice %34 {offsets = [0, 16], sizes = [16, 8], strides = [1, 1]} : vector<16x96xf32> to vector<16x8xf32>
    %70 = vector.extract_strided_slice %34 {offsets = [0, 48], sizes = [16, 8], strides = [1, 1]} : vector<16x96xf32> to vector<16x8xf32>
    %71 = vector.extract_strided_slice %34 {offsets = [0, 80], sizes = [16, 8], strides = [1, 1]} : vector<16x96xf32> to vector<16x8xf32>
    %cst_29 = arith.constant dense<0.000000e+00> : vector<16x16xf32>
    %72 = tpu.matmul %69, %70, %cst_29 {dimension_numbers = #tpu.dot_dimension_numbers<[1], [1], [0], [0], [0, 0, 1, 0], [], []>} : vector<16x8xf32>, vector<16x8xf32>, vector<16x16xf32> -> vector<16x16xf32>
    %cst_30 = arith.constant 0.353553385 : f32
    %73 = vector.broadcast %cst_30 : f32 to vector<16x16xf32>
    %74 = arith.mulf %72, %73 : vector<16x16xf32>
    %cst_31 = arith.constant dense<0xFF800000> : vector<16xf32>
    %75 = vector.multi_reduction <maximumf>, %74, %cst_31 [1] : vector<16x16xf32> to vector<16xf32>
    %76 = vector.shape_cast %75 : vector<16xf32> to vector<16x1xf32>
    %77 = vector.broadcast %76 : vector<16x1xf32> to vector<16x16xf32>
    %78 = arith.subf %74, %77 : vector<16x16xf32>
    %79 = math.exp %78 : vector<16x16xf32>
    %cst_32 = arith.constant dense<0.000000e+00> : vector<16xf32>
    %80 = vector.multi_reduction <add>, %79, %cst_32 [1] : vector<16x16xf32> to vector<16xf32>
    %81 = vector.shape_cast %80 : vector<16xf32> to vector<16x1xf32>
    %82 = tpu.reciprocal %81 {approx = true} : vector<16x1xf32> -> vector<16x1xf32>
    %83 = vector.broadcast %82 : vector<16x1xf32> to vector<16x16xf32>
    %84 = arith.mulf %79, %83 : vector<16x16xf32>
    %cst_33 = arith.constant dense<0.000000e+00> : vector<16x8xf32>
    %85 = tpu.matmul %84, %71, %cst_33 {dimension_numbers = #tpu.dot_dimension_numbers<[1], [0], [0], [1], [0, 0, 1, 1], [], []>} : vector<16x16xf32>, vector<16x8xf32>, vector<16x8xf32> -> vector<16x8xf32>
    %86 = vector.extract_strided_slice %34 {offsets = [0, 24], sizes = [16, 8], strides = [1, 1]} : vector<16x96xf32> to vector<16x8xf32>
    %87 = vector.extract_strided_slice %34 {offsets = [0, 56], sizes = [16, 8], strides = [1, 1]} : vector<16x96xf32> to vector<16x8xf32>
    %88 = vector.extract_strided_slice %34 {offsets = [0, 88], sizes = [16, 8], strides = [1, 1]} : vector<16x96xf32> to vector<16x8xf32>
    %cst_34 = arith.constant dense<0.000000e+00> : vector<16x16xf32>
    %89 = tpu.matmul %86, %87, %cst_34 {dimension_numbers = #tpu.dot_dimension_numbers<[1], [1], [0], [0], [0, 0, 1, 0], [], []>} : vector<16x8xf32>, vector<16x8xf32>, vector<16x16xf32> -> vector<16x16xf32>
    %cst_35 = arith.constant 0.353553385 : f32
    %90 = vector.broadcast %cst_35 : f32 to vector<16x16xf32>
    %91 = arith.mulf %89, %90 : vector<16x16xf32>
    %cst_36 = arith.constant dense<0xFF800000> : vector<16xf32>
    %92 = vector.multi_reduction <maximumf>, %91, %cst_36 [1] : vector<16x16xf32> to vector<16xf32>
    %93 = vector.shape_cast %92 : vector<16xf32> to vector<16x1xf32>
    %94 = vector.broadcast %93 : vector<16x1xf32> to vector<16x16xf32>
    %95 = arith.subf %91, %94 : vector<16x16xf32>
    %96 = math.exp %95 : vector<16x16xf32>
    %cst_37 = arith.constant dense<0.000000e+00> : vector<16xf32>
    %97 = vector.multi_reduction <add>, %96, %cst_37 [1] : vector<16x16xf32> to vector<16xf32>
    %98 = vector.shape_cast %97 : vector<16xf32> to vector<16x1xf32>
    %99 = tpu.reciprocal %98 {approx = true} : vector<16x1xf32> -> vector<16x1xf32>
    %100 = vector.broadcast %99 : vector<16x1xf32> to vector<16x16xf32>
    %101 = arith.mulf %96, %100 : vector<16x16xf32>
    %cst_38 = arith.constant dense<0.000000e+00> : vector<16x8xf32>
    %102 = tpu.matmul %101, %88, %cst_38 {dimension_numbers = #tpu.dot_dimension_numbers<[1], [0], [0], [1], [0, 0, 1, 1], [], []>} : vector<16x16xf32>, vector<16x8xf32>, vector<16x8xf32> -> vector<16x8xf32>
    %103 = tpu.concatenate %51, %68, %85, %102 in 1 : vector<16x8xf32>, vector<16x8xf32>, vector<16x8xf32>, vector<16x8xf32> -> vector<16x32xf32>
    %c0_39 = arith.constant 0 : index
    %c0_40 = arith.constant 0 : index
    %c0_41 = arith.constant 0 : index
    %104 = vector.load %arg7[%c0_39, %c0_40, %c0_41] : memref<1x32x32xf32, #tpu.memory_space<vmem>>, vector<1x32x32xf32>
    %105 = vector.shape_cast %104 : vector<1x32x32xf32> to vector<32x32xf32>
    %cst_42 = arith.constant dense<0.000000e+00> : vector<16x32xf32>
    %106 = tpu.matmul %103, %105, %cst_42 {dimension_numbers = #tpu.dot_dimension_numbers<[1], [0], [0], [1], [0, 0, 1, 1], [], []>} : vector<16x32xf32>, vector<32x32xf32>, vector<16x32xf32> -> vector<16x32xf32>
    %107 = arith.addf %3, %106 : vector<16x32xf32>
    %c0_43 = arith.constant 0 : index
    %c0_44 = arith.constant 0 : index
    %c0_45 = arith.constant 0 : index
    %108 = vector.load %arg8[%c0_43, %c0_44, %c0_45] : memref<1x1x32xf32, #tpu.memory_space<vmem>>, vector<1x1x32xf32>
    %109 = vector.shape_cast %108 : vector<1x1x32xf32> to vector<1x32xf32>
    %110 = vector.broadcast %109 : vector<1x32xf32> to vector<16x32xf32>
    %111 = arith.addf %107, %110 : vector<16x32xf32>
    %c0_46 = arith.constant 0 : index
    %c0_47 = arith.constant 0 : index
    %c0_48 = arith.constant 0 : index
    %112 = vector.load %arg9[%c0_46, %c0_47, %c0_48] : memref<1x1x32xf32, #tpu.memory_space<vmem>>, vector<1x1x32xf32>
    %113 = vector.shape_cast %112 : vector<1x1x32xf32> to vector<1x32xf32>
    %c0_49 = arith.constant 0 : index
    %c0_50 = arith.constant 0 : index
    %c0_51 = arith.constant 0 : index
    %114 = vector.load %arg10[%c0_49, %c0_50, %c0_51] : memref<1x1x32xf32, #tpu.memory_space<vmem>>, vector<1x1x32xf32>
    %115 = vector.shape_cast %114 : vector<1x1x32xf32> to vector<1x32xf32>
    %cst_52 = arith.constant dense<0.000000e+00> : vector<16xf32>
    %116 = vector.multi_reduction <add>, %111, %cst_52 [1] : vector<16x32xf32> to vector<16xf32>
    %117 = vector.shape_cast %116 : vector<16xf32> to vector<16x1xf32>
    %cst_53 = arith.constant 3.200000e+01 : f32
    %118 = vector.broadcast %cst_53 : f32 to vector<16x1xf32>
    %119 = arith.divf %117, %118 : vector<16x1xf32>
    %120 = vector.broadcast %119 : vector<16x1xf32> to vector<16x32xf32>
    %121 = arith.subf %111, %120 : vector<16x32xf32>
    %122 = arith.mulf %121, %121 : vector<16x32xf32>
    %cst_54 = arith.constant dense<0.000000e+00> : vector<16xf32>
    %123 = vector.multi_reduction <add>, %122, %cst_54 [1] : vector<16x32xf32> to vector<16xf32>
    %124 = vector.shape_cast %123 : vector<16xf32> to vector<16x1xf32>
    %cst_55 = arith.constant 3.200000e+01 : f32
    %125 = vector.broadcast %cst_55 : f32 to vector<16x1xf32>
    %126 = arith.divf %124, %125 : vector<16x1xf32>
    %cst_56 = arith.constant 9.99999996E-13 : f32
    %127 = vector.broadcast %cst_56 : f32 to vector<16x1xf32>
    %128 = arith.addf %126, %127 : vector<16x1xf32>
    %129 = math.rsqrt %128 : vector<16x1xf32>
    %130 = vector.broadcast %129 : vector<16x1xf32> to vector<16x32xf32>
    %131 = arith.mulf %121, %130 : vector<16x32xf32>
    %132 = vector.broadcast %113 : vector<1x32xf32> to vector<16x32xf32>
    %133 = arith.mulf %131, %132 : vector<16x32xf32>
    %134 = vector.broadcast %115 : vector<1x32xf32> to vector<16x32xf32>
    %135 = arith.addf %133, %134 : vector<16x32xf32>
    %c0_57 = arith.constant 0 : index
    %c0_58 = arith.constant 0 : index
    %c0_59 = arith.constant 0 : index
    %136 = vector.load %arg11[%c0_57, %c0_58, %c0_59] : memref<1x32x128xf32, #tpu.memory_space<vmem>>, vector<1x32x128xf32>
    %137 = vector.shape_cast %136 : vector<1x32x128xf32> to vector<32x128xf32>
    %cst_60 = arith.constant dense<0.000000e+00> : vector<16x128xf32>
    %138 = tpu.matmul %135, %137, %cst_60 {dimension_numbers = #tpu.dot_dimension_numbers<[1], [0], [0], [1], [0, 0, 1, 1], [], []>} : vector<16x32xf32>, vector<32x128xf32>, vector<16x128xf32> -> vector<16x128xf32>
    %c0_61 = arith.constant 0 : index
    %c0_62 = arith.constant 0 : index
    %c0_63 = arith.constant 0 : index
    %139 = vector.load %arg12[%c0_61, %c0_62, %c0_63] : memref<1x1x128xf32, #tpu.memory_space<vmem>>, vector<1x1x128xf32>
    %140 = vector.shape_cast %139 : vector<1x1x128xf32> to vector<1x128xf32>
    %141 = vector.broadcast %140 : vector<1x128xf32> to vector<16x128xf32>
    %142 = arith.addf %138, %141 : vector<16x128xf32>
    %cst_64 = arith.constant 5.000000e-01 : f32
    %143 = vector.broadcast %cst_64 : f32 to vector<16x128xf32>
    %144 = arith.mulf %143, %142 : vector<16x128xf32>
    %cst_65 = arith.constant 0.707106769 : f32
    %145 = vector.broadcast %cst_65 : f32 to vector<16x128xf32>
    %146 = arith.mulf %142, %145 : vector<16x128xf32>
    %cst_66 = arith.constant 0.000000e+00 : f32
    %147 = vector.broadcast %cst_66 : f32 to vector<16x128xf32>
    %148 = arith.cmpf oge, %146, %147 : vector<16x128xf32>
    %cst_67 = arith.constant 1.000000e+00 : f32
    %cst_68 = arith.constant -1.000000e+00 : f32
    %149 = vector.broadcast %cst_67 : f32 to vector<16x128xf32>
    %150 = vector.broadcast %cst_68 : f32 to vector<16x128xf32>
    %151 = arith.select %148, %149, %150 : vector<16x128xi1>, vector<16x128xf32>
    %152 = math.absf %146 : vector<16x128xf32>
    %cst_69 = arith.constant 0.327591091 : f32
    %153 = vector.broadcast %cst_69 : f32 to vector<16x128xf32>
    %154 = arith.mulf %153, %152 : vector<16x128xf32>
    %cst_70 = arith.constant 1.000000e+00 : f32
    %155 = vector.broadcast %cst_70 : f32 to vector<16x128xf32>
    %156 = arith.addf %155, %154 : vector<16x128xf32>
    %cst_71 = arith.constant 1.000000e+00 : f32
    %157 = vector.broadcast %cst_71 : f32 to vector<16x128xf32>
    %158 = arith.divf %157, %156 : vector<16x128xf32>
    %cst_72 = arith.constant 1.06140542 : f32
    %159 = vector.broadcast %cst_72 : f32 to vector<16x128xf32>
    %160 = arith.mulf %159, %158 : vector<16x128xf32>
    %cst_73 = arith.constant -1.45315206 : f32
    %161 = vector.broadcast %cst_73 : f32 to vector<16x128xf32>
    %162 = arith.addf %160, %161 : vector<16x128xf32>
    %163 = arith.mulf %162, %158 : vector<16x128xf32>
    %cst_74 = arith.constant 1.42141378 : f32
    %164 = vector.broadcast %cst_74 : f32 to vector<16x128xf32>
    %165 = arith.addf %163, %164 : vector<16x128xf32>
    %166 = arith.mulf %165, %158 : vector<16x128xf32>
    %cst_75 = arith.constant -0.284496725 : f32
    %167 = vector.broadcast %cst_75 : f32 to vector<16x128xf32>
    %168 = arith.addf %166, %167 : vector<16x128xf32>
    %169 = arith.mulf %168, %158 : vector<16x128xf32>
    %cst_76 = arith.constant 0.254829586 : f32
    %170 = vector.broadcast %cst_76 : f32 to vector<16x128xf32>
    %171 = arith.addf %169, %170 : vector<16x128xf32>
    %172 = arith.mulf %171, %158 : vector<16x128xf32>
    %cst_77 = arith.constant 0.000000e+00 : f32
    %173 = vector.broadcast %cst_77 : f32 to vector<16x128xf32>
    %174 = arith.subf %173, %152 : vector<16x128xf32>
    %175 = arith.mulf %174, %152 : vector<16x128xf32>
    %176 = math.exp %175 : vector<16x128xf32>
    %177 = arith.mulf %172, %176 : vector<16x128xf32>
    %cst_78 = arith.constant 1.000000e+00 : f32
    %178 = vector.broadcast %cst_78 : f32 to vector<16x128xf32>
    %179 = arith.subf %178, %177 : vector<16x128xf32>
    %180 = arith.mulf %151, %179 : vector<16x128xf32>
    %cst_79 = arith.constant 1.000000e+00 : f32
    %181 = vector.broadcast %cst_79 : f32 to vector<16x128xf32>
    %182 = arith.addf %181, %180 : vector<16x128xf32>
    %183 = arith.mulf %144, %182 : vector<16x128xf32>
    %c0_80 = arith.constant 0 : index
    %c0_81 = arith.constant 0 : index
    %c0_82 = arith.constant 0 : index
    %184 = vector.load %arg13[%c0_80, %c0_81, %c0_82] : memref<1x128x32xf32, #tpu.memory_space<vmem>>, vector<1x128x32xf32>
    %185 = vector.shape_cast %184 : vector<1x128x32xf32> to vector<128x32xf32>
    %cst_83 = arith.constant dense<0.000000e+00> : vector<16x32xf32>
    %186 = tpu.matmul %183, %185, %cst_83 {dimension_numbers = #tpu.dot_dimension_numbers<[1], [0], [0], [1], [0, 0, 1, 1], [], []>} : vector<16x128xf32>, vector<128x32xf32>, vector<16x32xf32> -> vector<16x32xf32>
    %187 = arith.addf %111, %186 : vector<16x32xf32>
    %c0_84 = arith.constant 0 : index
    %c0_85 = arith.constant 0 : index
    %c0_86 = arith.constant 0 : index
    %188 = vector.load %arg14[%c0_84, %c0_85, %c0_86] : memref<1x1x32xf32, #tpu.memory_space<vmem>>, vector<1x1x32xf32>
    %189 = vector.shape_cast %188 : vector<1x1x32xf32> to vector<1x32xf32>
    %190 = vector.broadcast %189 : vector<1x32xf32> to vector<16x32xf32>
    %191 = arith.addf %187, %190 : vector<16x32xf32>
    %c0_87 = arith.constant 0 : index
    %c0_88 = arith.constant 0 : index
    %192 = vector.load %arg22[%c0_87, %c0_88] : memref<16x32xf32, #tpu.memory_space<vmem>>, vector<16x32xf32>
    tpu.vector_store %arg22[%c0_87, %c0_88], %191 {strides = array<i32>} : memref<16x32xf32, #tpu.memory_space<vmem>>, vector<16x32xf32>,
    %c1_i32 = arith.constant 1 : i32
    %193 = arith.cmpi eq, %arg1, %c1_i32 : i32
    %194 = arith.extui %193 : i1 to i32
    %c0_i32_89 = arith.constant 0 : i32
    %195 = arith.cmpi ne, %194, %c0_i32_89 : i32
    scf.if %195 {
      %196 = vector.extract_strided_slice %191 {offsets = [0, 0], sizes = [1, 32], strides = [1, 1]} : vector<16x32xf32> to vector<1x32xf32>
      %c0_90 = arith.constant 0 : index
      %c0_91 = arith.constant 0 : index
      %197 = vector.load %arg15[%c0_90, %c0_91] : memref<1x32xf32, #tpu.memory_space<vmem>>, vector<1x32xf32>
      %c0_92 = arith.constant 0 : index
      %c0_93 = arith.constant 0 : index
      %198 = vector.load %arg16[%c0_92, %c0_93] : memref<1x32xf32, #tpu.memory_space<vmem>>, vector<1x32xf32>
      %cst_94 = arith.constant dense<0.000000e+00> : vector<1xf32>
      %199 = vector.multi_reduction <add>, %196, %cst_94 [1] : vector<1x32xf32> to vector<1xf32>
      %200 = vector.shape_cast %199 : vector<1xf32> to vector<1x1xf32>
      %cst_95 = arith.constant 3.200000e+01 : f32
      %201 = vector.broadcast %cst_95 : f32 to vector<1x1xf32>
      %202 = arith.divf %200, %201 : vector<1x1xf32>
      %203 = vector.broadcast %202 : vector<1x1xf32> to vector<1x32xf32>
      %204 = arith.subf %196, %203 : vector<1x32xf32>
      %205 = arith.mulf %204, %204 : vector<1x32xf32>
      %cst_96 = arith.constant dense<0.000000e+00> : vector<1xf32>
      %206 = vector.multi_reduction <add>, %205, %cst_96 [1] : vector<1x32xf32> to vector<1xf32>
      %207 = vector.shape_cast %206 : vector<1xf32> to vector<1x1xf32>
      %cst_97 = arith.constant 3.200000e+01 : f32
      %208 = vector.broadcast %cst_97 : f32 to vector<1x1xf32>
      %209 = arith.divf %207, %208 : vector<1x1xf32>
      %cst_98 = arith.constant 9.99999996E-13 : f32
      %210 = vector.broadcast %cst_98 : f32 to vector<1x1xf32>
      %211 = arith.addf %209, %210 : vector<1x1xf32>
      %212 = math.rsqrt %211 : vector<1x1xf32>
      %213 = vector.broadcast %212 : vector<1x1xf32> to vector<1x32xf32>
      %214 = arith.mulf %204, %213 : vector<1x32xf32>
      %215 = arith.mulf %214, %197 : vector<1x32xf32>
      %216 = arith.addf %215, %198 : vector<1x32xf32>
      %c0_99 = arith.constant 0 : index
      %c0_100 = arith.constant 0 : index
      %217 = vector.load %arg17[%c0_99, %c0_100] : memref<32x64xf32, #tpu.memory_space<vmem>>, vector<32x64xf32>
      %cst_101 = arith.constant dense<0.000000e+00> : vector<1x64xf32>
      %218 = tpu.matmul %216, %217, %cst_101 {dimension_numbers = #tpu.dot_dimension_numbers<[1], [0], [0], [1], [0, 0, 1, 1], [], []>} : vector<1x32xf32>, vector<32x64xf32>, vector<1x64xf32> -> vector<1x64xf32>
      %c0_102 = arith.constant 0 : index
      %c0_103 = arith.constant 0 : index
      %219 = vector.load %arg18[%c0_102, %c0_103] : memref<1x64xf32, #tpu.memory_space<vmem>>, vector<1x64xf32>
      %220 = arith.addf %218, %219 : vector<1x64xf32>
      %c0_104 = arith.constant 0 : index
      %c0_105 = arith.constant 0 : index
      %221 = vector.load %arg19[%c0_104, %c0_105] : memref<64x2xf32, #tpu.memory_space<vmem>>, vector<64x2xf32>
      %cst_106 = arith.constant dense<0.000000e+00> : vector<1x2xf32>
      %222 = tpu.matmul %220, %221, %cst_106 {dimension_numbers = #tpu.dot_dimension_numbers<[1], [0], [0], [1], [0, 0, 1, 1], [], []>} : vector<1x64xf32>, vector<64x2xf32>, vector<1x2xf32> -> vector<1x2xf32>
      %c0_107 = arith.constant 0 : index
      %c0_108 = arith.constant 0 : index
      %223 = vector.load %arg20[%c0_107, %c0_108] : memref<1x2xf32, #tpu.memory_space<vmem>>, vector<1x2xf32>
      %224 = arith.addf %222, %223 : vector<1x2xf32>
      %c0_109 = arith.constant 0 : index
      %c0_110 = arith.constant 0 : index
      %c0_111 = arith.constant 0 : index
      %225 = vector.load %arg21[%c0_109, %c0_110, %c0_111] : memref<1x1x2xf32, #tpu.memory_space<vmem>>, vector<1x1x2xf32>
      %226 = vector.shape_cast %225 : vector<1x1x2xf32> to vector<1x2xf32>
      %227 = vector.shape_cast %224 : vector<1x2xf32> to vector<1x1x2xf32>
      tpu.vector_store %arg21[%c0_109, %c0_110, %c0_111], %227 {strides = array<i32>} : memref<1x1x2xf32, #tpu.memory_space<vmem>>, vector<1x1x2xf32>,
    } else {
    }
    return
  }
  func.func @transform_0(%arg0: i32, %arg1: i32) -> (i32, i32, i32) {
    %c0_i32 = arith.constant 0 : i32
    %c0_i32_0 = arith.constant 0 : i32
    %c0_i32_1 = arith.constant 0 : i32
    return %arg0, %c0_i32, %c0_i32_0 : i32, i32, i32
  }
  func.func @transform_1(%arg0: i32, %arg1: i32) -> (i32, i32, i32) {
    %c0_i32 = arith.constant 0 : i32
    %c0_i32_0 = arith.constant 0 : i32
    %c0_i32_1 = arith.constant 0 : i32
    return %arg1, %c0_i32, %c0_i32_0 : i32, i32, i32
  }
  func.func @transform_2(%arg0: i32, %arg1: i32) -> (i32, i32, i32) {
    %c0_i32 = arith.constant 0 : i32
    %c0_i32_0 = arith.constant 0 : i32
    %c0_i32_1 = arith.constant 0 : i32
    return %arg1, %c0_i32, %c0_i32_0 : i32, i32, i32
  }
  func.func @transform_3(%arg0: i32, %arg1: i32) -> (i32, i32, i32) {
    %c0_i32 = arith.constant 0 : i32
    %c0_i32_0 = arith.constant 0 : i32
    %c0_i32_1 = arith.constant 0 : i32
    return %arg1, %c0_i32, %c0_i32_0 : i32, i32, i32
  }
  func.func @transform_4(%arg0: i32, %arg1: i32) -> (i32, i32, i32) {
    %c0_i32 = arith.constant 0 : i32
    %c0_i32_0 = arith.constant 0 : i32
    %c0_i32_1 = arith.constant 0 : i32
    return %arg1, %c0_i32, %c0_i32_0 : i32, i32, i32
  }
  func.func @transform_5(%arg0: i32, %arg1: i32) -> (i32, i32, i32) {
    %c0_i32 = arith.constant 0 : i32
    %c0_i32_0 = arith.constant 0 : i32
    %c0_i32_1 = arith.constant 0 : i32
    return %arg1, %c0_i32, %c0_i32_0 : i32, i32, i32
  }
  func.func @transform_6(%arg0: i32, %arg1: i32) -> (i32, i32, i32) {
    %c0_i32 = arith.constant 0 : i32
    %c0_i32_0 = arith.constant 0 : i32
    %c0_i32_1 = arith.constant 0 : i32
    return %arg1, %c0_i32, %c0_i32_0 : i32, i32, i32
  }
  func.func @transform_7(%arg0: i32, %arg1: i32) -> (i32, i32, i32) {
    %c0_i32 = arith.constant 0 : i32
    %c0_i32_0 = arith.constant 0 : i32
    %c0_i32_1 = arith.constant 0 : i32
    return %arg1, %c0_i32, %c0_i32_0 : i32, i32, i32
  }
  func.func @transform_8(%arg0: i32, %arg1: i32) -> (i32, i32, i32) {
    %c0_i32 = arith.constant 0 : i32
    %c0_i32_0 = arith.constant 0 : i32
    %c0_i32_1 = arith.constant 0 : i32
    return %arg1, %c0_i32, %c0_i32_0 : i32, i32, i32
  }
  func.func @transform_9(%arg0: i32, %arg1: i32) -> (i32, i32, i32) {
    %c0_i32 = arith.constant 0 : i32
    %c0_i32_0 = arith.constant 0 : i32
    %c0_i32_1 = arith.constant 0 : i32
    return %arg1, %c0_i32, %c0_i32_0 : i32, i32, i32
  }
  func.func @transform_10(%arg0: i32, %arg1: i32) -> (i32, i32, i32) {
    %c0_i32 = arith.constant 0 : i32
    %c0_i32_0 = arith.constant 0 : i32
    %c0_i32_1 = arith.constant 0 : i32
    return %arg1, %c0_i32, %c0_i32_0 : i32, i32, i32
  }
  func.func @transform_11(%arg0: i32, %arg1: i32) -> (i32, i32, i32) {
    %c0_i32 = arith.constant 0 : i32
    %c0_i32_0 = arith.constant 0 : i32
    %c0_i32_1 = arith.constant 0 : i32
    return %arg1, %c0_i32, %c0_i32_0 : i32, i32, i32
  }
  func.func @transform_12(%arg0: i32, %arg1: i32) -> (i32, i32, i32) {
    %c0_i32 = arith.constant 0 : i32
    %c0_i32_0 = arith.constant 0 : i32
    %c0_i32_1 = arith.constant 0 : i32
    return %arg1, %c0_i32, %c0_i32_0 : i32, i32, i32
  }
  func.func @transform_13(%arg0: i32, %arg1: i32) -> (i32, i32) {
    %c0_i32 = arith.constant 0 : i32
    %c0_i32_0 = arith.constant 0 : i32
    %c0_i32_1 = arith.constant 0 : i32
    return %c0_i32, %c0_i32_0 : i32, i32
  }
  func.func @transform_14(%arg0: i32, %arg1: i32) -> (i32, i32) {
    %c0_i32 = arith.constant 0 : i32
    %c0_i32_0 = arith.constant 0 : i32
    %c0_i32_1 = arith.constant 0 : i32
    return %c0_i32, %c0_i32_0 : i32, i32
  }
  func.func @transform_15(%arg0: i32, %arg1: i32) -> (i32, i32) {
    %c0_i32 = arith.constant 0 : i32
    %c0_i32_0 = arith.constant 0 : i32
    %c0_i32_1 = arith.constant 0 : i32
    return %c0_i32, %c0_i32_0 : i32, i32
  }
  func.func @transform_16(%arg0: i32, %arg1: i32) -> (i32, i32) {
    %c0_i32 = arith.constant 0 : i32
    %c0_i32_0 = arith.constant 0 : i32
    %c0_i32_1 = arith.constant 0 : i32
    return %c0_i32, %c0_i32_0 : i32, i32
  }
  func.func @transform_17(%arg0: i32, %arg1: i32) -> (i32, i32) {
    %c0_i32 = arith.constant 0 : i32
    %c0_i32_0 = arith.constant 0 : i32
    %c0_i32_1 = arith.constant 0 : i32
    return %c0_i32, %c0_i32_0 : i32, i32
  }
  func.func @transform_18(%arg0: i32, %arg1: i32) -> (i32, i32) {
    %c0_i32 = arith.constant 0 : i32
    %c0_i32_0 = arith.constant 0 : i32
    %c0_i32_1 = arith.constant 0 : i32
    return %c0_i32, %c0_i32_0 : i32, i32
  }
  func.func @transform_19(%arg0: i32, %arg1: i32) -> (i32, i32, i32) {
    %c0_i32 = arith.constant 0 : i32
    %c0_i32_0 = arith.constant 0 : i32
    %c0_i32_1 = arith.constant 0 : i32
    return %arg0, %c0_i32, %c0_i32_0 : i32, i32, i32
  }
}

</mosaic_0001>

<bundles_post_ra>
// kernel: eegvit_forward.2
= control target key start
LH: loop header
LB: loop body
LE: loop exit
PB: predicated region body
PF: predicated region fallthrough
CT: control target
= control target key end

     0   :  { %vm71_vm0 = vcmask 261120   ;;  %vm199_vm1 = vcmask 523264   ;;  %vm244_vm2 = vcmask 259072   ;;  %s496_s1 = inlined_call_operand.vmem [shape: f32[288,64], index: 1, kind: input, shape index: {}]   ;;  %s497_s0 = inlined_call_operand.vmem [shape: f32[30,288], index: 0, kind: input, shape index: {}]   ;;  %s498_s4 = inlined_call_operand.vmem [shape: f32[64,32], index: 4, kind: input, shape index: {}]   ;;  %s499_s2 = inlined_call_operand.vmem [shape: f32[1,64], index: 2, kind: input, shape index: {}]   ;;  %s500_s3 = inlined_call_operand.vmem [shape: f32[1,64], index: 3, kind: input, shape index: {}]   ;;  %s501_s5 = inlined_call_operand.vmem [shape: f32[1,32], index: 5, kind: input, shape index: {}]   ;;  %s502_s6 = inlined_call_operand.vmem [shape: f32[30,32], index: 6, kind: output, shape index: {}]  }
   0x1   :  { %v50_v0 = vld [vmem:[%s496_s1 + $0x78] sm:$0xff]  ;;  %v49_v2 = vld [vmem:[%s496_s1 + $0x70] sm:$0xff]  ;;  %v48_v4 = vld [vmem:[%s496_s1 + $0x68] sm:$0xff] }
   0x2   :  { %v66_v1 = vld [vmem:[%s496_s1 + $0xf8] sm:$0xff]  ;;  %84 = vmatpush.msra.mxu0 %v50_v0  ;;  %v65_v3 = vld [vmem:[%s496_s1 + $0xf0] sm:$0xff]  ;;  %v64_v5 = vld [vmem:[%s496_s1 + $0xe8] sm:$0xff] }
   0x3   :  { %113 = vmatpush.msra.mxu1 %v66_v1  ;;  %v47_v6 = vld [vmem:[%s496_s1 + $0x60] sm:$0xff]  ;;  %v46_v8 = vld [vmem:[%s496_s1 + $0x58] sm:$0xff]  ;;  %v45_v11 = vld [vmem:[%s496_s1 + $0x50] sm:$0xff] }
   0x4   :  { %85 = vmatpush.msra.mxu0 %v49_v2  ;;  %v63_v7 = vld [vmem:[%s496_s1 + $0xe0] sm:$0xff]  ;;  %v62_v9 = vld [vmem:[%s496_s1 + $0xd8] sm:$0xff]  ;;  %v61_v12 = vld [vmem:[%s496_s1 + $0xd0] sm:$0xff] }
   0x5   :  { %114 = vmatpush.msra.mxu1 %v65_v3  ;;  %v70_v10 = vld [vmem:[%s496_s1 + $0x118] sm:$0xff]  ;;  %v69_v13 = vld [vmem:[%s496_s1 + $0x110] sm:$0xff]  ;;  %v68_v14 = vld [vmem:[%s496_s1 + $0x108] sm:$0xff] }
   0x6   :  { %86 = vmatpush.msra.mxu0 %v48_v4  ;;  %154 = vmatpush.msra.mxu2 %v70_v10  ;;  %v44_v15 = vld [vmem:[%s496_s1 + $0x48] sm:$0xff]  ;;  %v67_v17 = vld [vmem:[%s496_s1 + $0x100] sm:$0xff]  ;;  %v25_v20 = vld [vmem:[%s497_s0 + $0x10] sm:$0xff] }
   0x7   :  { %115 = vmatpush.msra.mxu1 %v64_v5  ;;  %v60_v16 = vld [vmem:[%s496_s1 + $0xc8] sm:$0xff]  ;;  %v43_v18 = vld [vmem:[%s496_s1 + $0x40] sm:$0xff]  ;;  %v42_v21 = vld [vmem:[%s496_s1 + $0x38] sm:$0xff] }
   0x8   :  { %87 = vmatpush.msra.mxu0 %v47_v6  ;;  %155 = vmatpush.msra.mxu2 %v69_v13  ;;  %v59_v19 = vld [vmem:[%s496_s1 + $0xc0] sm:$0xff]  ;;  %v58_v22 = vld [vmem:[%s496_s1 + $0xb8] sm:$0xff]  ;;  %v41_v23 = vld [vmem:[%s496_s1 + $0x30] sm:$0xff] }
   0x9   :  { %116 = vmatpush.msra.mxu1 %v63_v7  ;;  %v57_v24 = vld [vmem:[%s496_s1 + $0xb0] sm:$0xff]  ;;  %v40_v25 = vld [vmem:[%s496_s1 + $0x28] sm:$0xff]  ;;  %v39_v27 = vld [vmem:[%s496_s1 + $0x20] sm:$0xff] }
   0xa   :  { %88 = vmatpush.msra.mxu0 %v46_v8  ;;  %156 = vmatpush.msra.mxu2 %v68_v14  ;;  %v56_v26 = vld [vmem:[%s496_s1 + $0xa8] sm:$0xff]  ;;  %v55_v28 = vld [vmem:[%s496_s1 + $0xa0] sm:$0xff]  ;;  %v38_v30 = vld [vmem:[%s496_s1 + $0x18] sm:$0xff] }
   0xb   :  { %117 = vmatpush.msra.mxu1 %v62_v9  ;;  %v28_v29 = vld [vmem:[%s497_s0 + $0x28] sm:$0xff]  ;;  %v54_v31 = vld [vmem:[%s496_s1 + $0x98] sm:$0xff]  ;;  %v37_v32 = vld [vmem:[%s496_s1 + $0x10] sm:$0xff] }
   0xc   :  { %89 = vmatpush.msra.mxu0 %v45_v11  ;;  %157 = vmatpush.msra.mxu2 %v67_v17  ;;  %v53_v33 = vld [vmem:[%s496_s1 + $0x90] sm:$0xff]  ;;  %v194_v34 = vld [vmem:[%s498_s4 + $0x38] sm:$0xff]  ;;  %v36_v36 = vld [vmem:[%s496_s1 + $0x8] sm:$0xff] }
   0xd   :  { %118 = vmatpush.msra.mxu1 %v61_v12  ;;  %250 = vmatmul.msk.f32.vlgmr.msra.gmra.mxu2 %vm71_vm0, %v25_v20  ;;  %v193_v35 = vld [vmem:[%s498_s4 + $0x30] sm:$0xff]  ;;  %v52_v37 = vld [vmem:[%s496_s1 + $0x88] sm:$0xff]  ;;  %v35_v39 = vld [vmem:[%s496_s1] sm:$0xff] }
   0xe   :  { %90 = vmatpush.msra.mxu0 %v44_v15  ;;  %220 = vmatpush.msra.mxu3 %v194_v34  ;;  %v192_v38 = vld [vmem:[%s498_s4 + $0x28] sm:$0xff]  ;;  %v51_v40 = vld [vmem:[%s496_s1 + $0x80] sm:$0xff]  ;;  %v26_v44 = vld [vmem:[%s497_s0 + $0x18] sm:$0xff] }
   0xf   :  { %119 = vmatpush.msra.mxu1 %v60_v16  ;;  %v23_v41 = vld [vmem:[%s497_s0] sm:$0xff]  ;;  %v24_v42 = vld [vmem:[%s497_s0 + $0x8] sm:$0xff]  ;;  %v34_v46 = vld [vmem:[%s497_s0 + $0x58] sm:$0x3f] }
  0x10   :  { %91 = vmatpush.msra.mxu0 %v43_v18  ;;  %221 = vmatpush.msra.mxu3 %v193_v35  ;;  %v31_v43 = vld [vmem:[%s497_s0 + $0x40] sm:$0xff]  ;;  %v29_v47 = vld [vmem:[%s497_s0 + $0x30] sm:$0xff]  ;;  %v30_v48 = vld [vmem:[%s497_s0 + $0x38] sm:$0xff] }
  0x11   :  { %120 = vmatpush.msra.mxu1 %v59_v19  ;;  %v27_v45 = vld [vmem:[%s497_s0 + $0x20] sm:$0xff]  ;;  %v32_v49 = vld [vmem:[%s497_s0 + $0x48] sm:$0x3f]  ;;  %v33_v50 = vld [vmem:[%s497_s0 + $0x50] sm:$0x3f] }
  0x12   :  { %92 = vmatpush.msra.mxu0 %v42_v21  ;;  %222 = vmatpush.msra.mxu3 %v192_v38  ;;  %v191_v51 = vld [vmem:[%s498_s4 + $0x20] sm:$0xff]  ;;  %v190_v52 = vld [vmem:[%s498_s4 + $0x18] sm:$0xff]  ;;  %v189_v53 = vld [vmem:[%s498_s4 + $0x10] sm:$0xff] }
  0x13   :  { %121 = vmatpush.msra.mxu1 %v58_v22  ;;  %v188_v54 = vld [vmem:[%s498_s4 + $0x8] sm:$0xff]  ;;  %v187_v55 = vld [vmem:[%s498_s4] sm:$0xff] }
  0x14   :  { %93 = vmatpush.msra.mxu0 %v41_v23  ;;  %223 = vmatpush.msra.mxu3 %v191_v51  ;;  %v258_v60 = vld [vmem:[%s499_s2] ss:$0 sm:$0xff] }
  0x15   :  { %122 = vmatpush.msra.mxu1 %v57_v24  ;;  %251 = vmatmul.msk.f32.gmra.mxu2 %vm71_vm0, %v28_v29  ;;  %v259_v62 = vld [vmem:[%s500_s3] ss:$0 sm:$0xff] }
  0x16   :  { %94 = vmatpush.msra.mxu0 %v40_v25  ;;  %224 = vmatpush.msra.mxu3 %v190_v52  ;;  %v260_v22 = vld [vmem:[%s501_s5] ss:$0 sm:$0xff] }
  0x17   :  { %123 = vmatpush.msra.mxu1 %v56_v26 }
  0x18   :  { %95 = vmatpush.msra.mxu0 %v39_v27  ;;  %225 = vmatpush.msra.mxu3 %v189_v53 }
  0x19   :  { %124 = vmatpush.msra.mxu1 %v55_v28 }
  0x1a   :  { %96 = vmatpush.msra.mxu0 %v38_v30  ;;  %226 = vmatpush.msra.mxu3 %v188_v54 }
  0x1b   :  { %125 = vmatpush.msra.mxu1 %v54_v31 }
  0x1c   :  { %97 = vmatpush.msra.mxu0 %v37_v32  ;;  %227 = vmatpush.msra.mxu3 %v187_v55 }
  0x1d   :  { %126 = vmatpush.msra.mxu1 %v53_v33  ;;  %252 = vmatmul.msk.f32.gmra.mxu2 %vm71_vm0, %v31_v43 }
  0x1e   :  { %98 = vmatpush.msra.mxu0 %v36_v36 }
  0x1f   :  { %127 = vmatpush.msra.mxu1 %v52_v37 }
  0x20   :  { %99 = vmatpush.msra.mxu0 %v35_v39 }
  0x21   :  { %128 = vmatpush.msra.mxu1 %v51_v40  ;;  %100 = vmatmul.f32.vlgmr.msra.gmra.mxu0 %v23_v41 }
  0x22   :  { %129 = vmatmul.f32.vlgmr.msra.gmra.mxu1 %v24_v42 }
  0x25   :  { %253 = vmatmul.msk.f32.gmra.mxu2 %vm71_vm0, %v34_v46 }
  0x29   :  { %103 = vmatmul.f32.gmra.mxu0 %v26_v44 }
  0x2a   :  { %132 = vmatmul.f32.gmra.mxu1 %v27_v45 }
  0x31   :  { %106 = vmatmul.f32.gmra.mxu0 %v29_v47 }
  0x32   :  { %135 = vmatmul.f32.gmra.mxu1 %v30_v48 }
  0x39   :  { %109 = vmatmul.f32.gmra.mxu0 %v32_v49 }
  0x3a   :  { %138 = vmatmul.f32.gmra.mxu1 %v33_v50 }
  0x90   :  { %v159_v56 = vpop.f32.mrf.mxu2 }
  0x98   :  { %v162_v63 = vpop.f32.mrf.mxu2 }
  0x9e   :  { %v101_v57 = vpop.f32.mrf.mxu0 }
  0x9f   :  { %v130_v58 = vpop.f32.mrf.mxu1 }
  0xa0   :  { %v131_v59 = vadd.f32 %v130_v58, %v101_v57  ;;  %v165_v7 = vpop.f32.mrf.mxu2 }
  0xa2   :  { %v160_v61 = vadd.f32 %v159_v56, %v131_v59 }
  0xa4   :  { %v175_v0 = vmul.f32 %v258_v60, %v160_v61 }
  0xa6   :  { %v183_v1 = vadd.f32 %v259_v62, %v175_v0  ;;  %v104_v2 = vpop.f32.mrf.mxu0 }
  0xa7   :  { %v133_v3 = vpop.f32.mrf.mxu1 }
  0xa8   :  { %v134_v4 = vadd.f32 %v133_v3, %v104_v2  ;;  %254 = vmatmul.msk.f32.vlgmr.msra.gmra.mxu3 %vm199_vm1, %v183_v1  ;;  %v168_v15 = vpop.f32.mrf.mxu2 }
  0xaa   :  { %v163_v5 = vadd.f32 %v162_v63, %v134_v4 }
  0xac   :  { %v176_v6 = vmul.f32 %v258_v60, %v163_v5 }
  0xae   :  { %v184_v8 = vadd.f32 %v259_v62, %v176_v6  ;;  %v107_v9 = vpop.f32.mrf.mxu0 }
  0xaf   :  { %v136_v10 = vpop.f32.mrf.mxu1 }
  0xb0   :  { %v137_v11 = vadd.f32 %v136_v10, %v107_v9  ;;  %255 = vmatmul.msk.f32.gmra.mxu3 %vm199_vm1, %v184_v8 }
  0xb2   :  { %v166_v12 = vadd.f32 %v165_v7, %v137_v11 }
  0xb4   :  { %v177_v13 = vmul.f32 %v258_v60, %v166_v12 }
  0xb6   :  { %v185_v14 = vadd.f32 %v259_v62, %v177_v13  ;;  %v110_v16 = vpop.f32.mrf.mxu0 }
  0xb7   :  { %v139_v17 = vpop.f32.mrf.mxu1 }
  0xb8   :  { %v140_v18 = vadd.f32 %v139_v17, %v110_v16  ;;  %256 = vmatmul.msk.f32.gmra.mxu3 %vm199_vm1, %v185_v14 }
  0xba   :  { %v169_v19 = vadd.f32 %v168_v15, %v140_v18 }
  0xbc   :  { %v178_v20 = vmul.f32 %v258_v60, %v169_v19 }
  0xbe   :  { %v186_v21 = vadd.f32 %v259_v62, %v178_v20 }
  0xc0   :  { %257 = vmatmul.msk.f32.gmra.mxu3 %vm199_vm1, %v186_v21 }
 0x12b   :  { %v229_v23 = vpop.f32.mrf.mxu3 }
 0x12c   :  { %v230_v24 = vadd.f32 %v260_v22, %v229_v23 }
 0x12e   :  { %241 = vst.msk [vmem:[%s502_s6] sm:$0xff] %vm71_vm0, %v230_v24 }
 0x133   :  { %v232_v25 = vpop.f32.mrf.mxu3 }
 0x134   :  { %v233_v26 = vadd.f32 %v260_v22, %v232_v25 }
 0x136   :  { %242 = vst.msk [vmem:[%s502_s6 + $0x8] sm:$0xff] %vm71_vm0, %v233_v26 }
 0x13b   :  { %v235_v27 = vpop.f32.mrf.mxu3 }
 0x13c   :  { %v236_v28 = vadd.f32 %v260_v22, %v235_v27 }
 0x13e   :  { %243 = vst.msk [vmem:[%s502_s6 + $0x10] sm:$0xff] %vm71_vm0, %v236_v28 }
 0x143   :  { %v238_v29 = vpop.f32.mrf.mxu3 }
 0x144   :  { %v239_v30 = vadd.f32 %v260_v22, %v238_v29 }
 0x146   :  { %245 = vst.msk [vmem:[%s502_s6 + $0x18] sm:$0x3f] %vm244_vm2, %v239_v30 }

// kernel: eegvit_forward.3
= control target key start
LH: loop header
LB: loop body
LE: loop exit
PB: predicated region body
PF: predicated region fallthrough
CT: control target
= control target key end

     0   :  { %s2790_s0 = inlined_call_operand.vmem [shape: f32[2,16,32], index: 0, kind: input, shape index: {}]   ;;  %s2791_s1 = inlined_call_operand.vmem [shape: f32[2,1,32], index: 1, kind: input, shape index: {}]   ;;  %s2792_s2 = inlined_call_operand.vmem [shape: f32[2,1,32], index: 2, kind: input, shape index: {}]   ;;  %s2793_s3 = inlined_call_operand.vmem [shape: f32[2,32,96], index: 3, kind: input, shape index: {}]   ;;  %s2794_s4 = inlined_call_operand.vmem [shape: f32[2,1,96], index: 4, kind: input, shape index: {}]   ;;  %s2795_s5 = inlined_call_operand.vmem [shape: f32[2,32,32], index: 5, kind: input, shape index: {}]   ;;  %s2796_s6 = inlined_call_operand.vmem [shape: f32[2,1,32], index: 6, kind: input, shape index: {}]   ;;  %s2797_s7 = inlined_call_operand.vmem [shape: f32[2,1,32], index: 7, kind: input, shape index: {}]   ;;  %s2798_s8 = inlined_call_operand.vmem [shape: f32[2,1,32], index: 8, kind: input, shape index: {}]   ;;  %s2799_s9 = inlined_call_operand.vmem [shape: f32[2,32,128], index: 9, kind: input, shape index: {}]   ;;  %s2800_s10 = inlined_call_operand.vmem [shape: f32[2,1,128], index: 10, kind: input, shape index: {}]   ;;  %s2801_s11 = inlined_call_operand.vmem [shape: f32[2,128,32], index: 11, kind: input, shape index: {}]   ;;  %s2802_s12 = inlined_call_operand.vmem [shape: f32[2,1,32], index: 12, kind: input, shape index: {}]   ;;  %s2803_s13 = inlined_call_operand.vmem [shape: f32[1,32], index: 13, kind: input, shape index: {}]   ;;  %s2804_s14 = inlined_call_operand.vmem [shape: f32[1,32], index: 14, kind: input, shape index: {}]   ;;  %s2805_s15 = inlined_call_operand.vmem [shape: f32[32,64], index: 15, kind: input, shape index: {}]   ;;  %s2806_s16 = inlined_call_operand.vmem [shape: f32[1,64], index: 16, kind: input, shape index: {}]   ;;  %s2807_s17 = inlined_call_operand.vmem [shape: f32[64,2], index: 17, kind: input, shape index: {}]   ;;  %s2808_s18 = inlined_call_operand.vmem [shape: f32[1,2], index: 18, kind: input, shape index: {}]   ;;  %s2809_s19 = inlined_call_operand.hbm [shape: f32[2,1,2], index: 19, kind: output, shape index: {}]  }
   0x1   :  { %2825 = sst [smem:[#allocation18_spill]] %s2790_s0 }
   0x2   :  { %2826 = sst [smem:[#allocation19_spill]] %s2791_s1 }
   0x3   :  { %2827 = sst [smem:[#allocation20_spill]] %s2792_s2 }
   0x4   :  { %2828 = sst [smem:[#allocation21_spill]] %s2793_s3 }
   0x5   :  { %2829 = sst [smem:[#allocation22_spill]] %s2803_s13 }
   0x6   :  { %2830 = sst [smem:[#allocation23_spill]] %s2804_s14 }
   0x7   :  { %2831 = sst [smem:[#allocation24_spill]] %s2805_s15 }
   0x8   :  { %2832 = sst [smem:[#allocation25_spill]] %s2806_s16 }
   0x9   :  { %2833 = sst [smem:[#allocation26_spill]] %s2807_s17 }
   0xa   :  { %2834 = sst [smem:[#allocation27_spill]] %s2808_s18 }
   0xb   :  { %2835 = sst [smem:[#allocation28_spill]] %s2809_s19 }
   0xc   :  { %24 = vsyncpa [#allocation4], 0 }
   0xd   :  { %26 = vsyncpa [#allocation4 + $0x1], 0  ;;  %s2332_s0 = smov 0   ;;  %s2334_s30 = smov 0  }
   0xe   :  { %s2336_s20 = smov 0   ;;  %s2338_s21 = smov 0  }
   0xf   :  { %s2340_s1 = smov 0   ;;  %s2342_s22 = smov 0  }
  0x10   :  { %s2344_s2 = smov 0   ;;  %s2346_s23 = smov 0  }
  0x11 LB: > { %2836 = sst [smem:[#allocation6_spill]] %s2186_s0  ;;  %s1895_s24 = sadd.s32 4294967295, %s2214_s23   ;;  %s2214_s23 = sphi %s2346_s23, %s32_s23   ;;  %s2210_s2 = sphi %s2344_s2, %s2884_s2   ;;  %s2206_s22 = sphi %s2342_s22, %s2883_s22   ;;  %s2202_s1 = sphi %s2340_s1, %s2882_s1   ;;  %s2198_s21 = sphi %s2338_s21, %s2881_s21   ;;  %s2194_s20 = sphi %s2336_s20, %s2880_s20   ;;  %s2190_s30 = sphi %s2334_s30, %s2886_s30   ;;  %s2186_s0 = sphi %s2332_s0, %s2885_s0  }
  0x12   : > { %2837 = sst [smem:[#allocation7_spill]] %s2194_s20  ;;  %s1896_s25 = sadd.s32 4294967294, %s2214_s23  }
  0x13   : > { %2838 = sst [smem:[#allocation8_spill]] %s2198_s21  ;;  %s41_s3 = sadd.s32 1, %s2206_s22 }
  0x14   : > { %2839 = sst [smem:[#allocation9_spill]] %s2202_s1  ;;  %p42_p0 = scmp.ge.s32.totalorder %s41_s3, 2 }
  0x15   : > { %2840 = sst [smem:[#allocation10_spill]] %s2206_s22  ;;  %s44_s26 = sadd.s32 1, %s2210_s2 }
  0x16   : > { %2841 = sst [smem:[#allocation11_spill]] %s2210_s2  ;;  %p525_p1 = scmp.ne.s32.totalorder %s2194_s20, %s2190_s30 }
  0x17   : > { %2842 = sst [smem:[#allocation12_spill]] %s2214_s23  ;;  %p526_p2 = scmp.eq.s32.totalorder %s1895_s24, 3 }
  0x18   : > { %s2888_s3 = smov (%p42_p0, %s41_s3), 0  ;;  %s2890_s26 = smov (!%p42_p0, %s44_s26), %s2210_s2 }
  0x19   : > { %2843 = sst [smem:[#allocation13_spill]] %s2888_s3  ;;  %p2381_p3 = por %p526_p2, %p525_p1 }
  0x1a   : > { %p531_p4 = scmp.ne.s32.totalorder %s2190_s30, %s2186_s0  ;;  %p46_p5 = scmp.ge.s32.totalorder %s2890_s26, 2 }
  0x1b   : > { %s2844_s27 = scalar_select %p2381_p3, 1, 0 }
  0x1c   : > { %p532_p6 = scmp.eq.s32.totalorder %s1896_s25, 3  ;;  %p1899_p7 = scmp.ge.s32.totalorder %s2214_s23, 1 }
  0x1d   : > { %2845 = sst [smem:[#allocation14_spill]] %s2844_s27  ;;  %p656_p8 = scmp.lt.s32.totalorder %s2214_s23, 5 }
  0x1e   : > { %s2892_s26 = smov (%p46_p5, %s2890_s26), 0  ;;  %p2391_p9 = por %p532_p6, %p531_p4 }
  0x1f   : > { %2846 = sst [smem:[#allocation15_spill]] %s2892_s26  ;;  %p657_p10 = pnand %p1899_p7, %p656_p8 }
  0x20   : > { %s2847_s28 = scalar_select %p2391_p9, 1, 0 }
  0x21   : > { %s512_s29 = ssub.s32 %s2210_s2, %s2892_s26  ;;  %s515_s24 = sadd.s32 1, %s2194_s20 }
  0x22   : > { %2848 = sst [smem:[#allocation16_spill]] %s2847_s28  ;;  %p513_p11 = scmp.eq.s32.totalorder %s512_s29, 0 }
  0x23   : > { %660 = sbr.rel (%p657_p10) target bundleno = 2891 (0xb4b), region = 96  ;;  %p755_p12 = scmp.lt.s32.totalorder (!%p657_p10), %s2202_s1, 1 }
  0x24   : > { %s2399_s3 = scalar_select %p513_p11, %s2194_s20, %s515_s24  }
  0x25   : > { %p760_p13 = scmp.lt.s32.totalorder (!%p657_p10), %s2198_s21, 1  ;;  %s2850_s2 = sld [smem:[#allocation18_spill]] (!%p657_p10) }
  0x26   : > { %2849 = sst [smem:[#allocation17_spill]] %s2399_s3  ;;  %s2854_s13 = sand.u32 (!%p657_p10), 1, %s2190_s30  }
  0x27   : > { %s2853_s17 = sld [smem:[#allocation21_spill]] (!%p657_p10)  ;;  %s2467_s14 = scalar_lea.vmem (!%p657_p10), [#allocation3], %s2854_s13 }
  0x28   : > { %s756_s22 = scalar_select %p755_p12, %s2202_s1, 1 }
  0x29   : > { %s2406_s0 = scalar_select %p760_p13, %s2198_s21, 1 }
  0x2a   : > { %s1946_s29 = sshll.u32 %s756_s22, 4  ;;  %s2855_s18 = sld [smem:[#allocation8_spill]] }
  0x2b   : > { %s759_s25 = scalar_lea.vmem %s2850_s2, %s1946_s29  ;;  %s1947_s16 = sshll.u32 %s2406_s0, 5 }
  0x2c   : > { %s2432_s29 = scalar_lea.vmem %s2795_s5, %s1947_s16  ;;  %s2449_s22 = scalar_lea.vmem %s2799_s9, %s1947_s16 }
  0x2d   : > { %s2423_s15 = scalar_lea.vmem %s2853_s17, %s1947_s16  ;;  %s787_s17 = scalar_lea.vmem %s2798_s8, %s2406_s0 }
  0x2e   : > { %s795_s26 = scalar_lea.vmem %s2800_s10, %s2406_s0  ;;  %s1950_s23 = sshll.u32 %s2406_s0, 7 }
  0x2f   : > { %s803_s19 = scalar_lea.vmem %s2802_s12, %s2406_s0  ;;  %s2463_s28 = scalar_lea.vmem %s2801_s11, %s1950_s23 }
  0x30   : > { %p1910_p0 = scmp.ne.s32.totalorder %s2855_s18, 0 }
  0x32   : > { %807 = sbr.rel (%p1910_p0) target bundleno = 58 (0x3a), region = 100 }
  0x37   : > { %v808_v0 = vld [vmem:[%s759_s25] sm:$0xff]  ;;  %vm810_vm0 = vcmask 261120   ;;  %v809_v1 = vld [vmem:[%s759_s25 + $0x8] sm:$0xff] }
  0x38   : > { %811 = vst.msk [vmem:[#allocation2] sm:$0xff] %vm810_vm0, %v808_v0 }
  0x39   : > { %812 = vst.msk [vmem:[#allocation2 + $0x8] sm:$0xff] %vm810_vm0, %v809_v1 }
  0x3a PF: > { %vm817_vm1 = vcmask 261120   ;;  %v2216_v6 = vmov 32.0   ;;  %v882_v23 = vld [vmem:[%s2423_s15 + $0x18] sm:$0xff]  ;;  %v881_v24 = vld [vmem:[%s2423_s15 + $0x10] sm:$0xff]  ;;  %v880_v25 = vld [vmem:[%s2423_s15 + $0x8] sm:$0xff]  ;;  %s2856_s23 = sld [smem:[#allocation19_spill]]  ;;  %s2860_s27 = scalar_lea.vmem %s2794_s4, %s2406_s0 }
  0x3b   : > { %2068 = vrcp.f32 %v2216_v6  ;;  %905 = vmatpush.msra.mxu0 %v882_v23  ;;  %v879_v26 = vld [vmem:[%s2423_s15] sm:$0xff]  ;;  %s2858_s2 = sld [smem:[#allocation20_spill]]  ;;  %s2217_s13 = smov 88   ;;  %vm922_vm9 = vcmask 64512   ;;  %vm956_vm10 = vcmask 130048   ;;  %vm1336_vm11 = vcmask 195584  }
  0x3c   : > { %v2062_v56 = vld [vmem:[%s2860_s27] ss:$0 sm:$0xff]  ;;  %s2218_s18 = smov 96   ;;  %s2219_s15 = smov 120  }
  0x3d   : > { %906 = vmatpush.msra.mxu0 %v881_v24  ;;  %s2220_s16 = smov 64   ;;  %s2223_s21 = smov 80  }
  0x3e   : > { %s2224_s24 = smov 112   ;;  %s2227_s3 = smov 40  }
  0x3f   : > { %v2470_v2 = vld [vmem:[#allocation2] sm:$0xff]  ;;  %907 = vmatpush.msra.mxu0 %v880_v25  ;;  %s2228_s1 = smov 8   ;;  %s2229_s27 = smov 16  }
  0x40   : > { %v818_v3 = vsel %vm817_vm1, %v2470_v2, 0.0  ;;  %v2474_v4 = vld [vmem:[#allocation2 + $0x8] sm:$0xff]  ;;  %s2857_s25 = scalar_lea.vmem %s2856_s23, %s2406_s0  ;;  %s2221_s23 = smov 104  }
  0x41   : > { %819 = vadd.xlane.f32.xlu0 %v818_v3  ;;  %v821_v5 = vsel %vm817_vm1, %v2474_v4, 0.0  ;;  %v2069_v7 = vpop.eup %2068  ;;  %908 = vmatpush.msra.mxu0 %v879_v26  ;;  %v2060_v41 = vld [vmem:[%s2857_s25] ss:$0 sm:$0xff]  ;;  %s2859_s20 = scalar_lea.vmem %s2858_s2, %s2406_s0  ;;  %s2222_s25 = smov 72  }
  0x42   : > { %v825_v8 = vmul.f32 32.0, %v2069_v7  ;;  %vm829_vm2 = vweird.f32 %v2069_v7  ;;  %v2061_v45 = vld [vmem:[%s2859_s20] ss:$0 sm:$0xff]  ;;  %s2225_s2 = smov 56   ;;  %s2226_s20 = smov 48  }
  0x44   : > { %v826_v9 = vsub.f32 1.0, %v825_v8 }
  0x46   : > { %v827_v10 = vmul.f32 %v2069_v7, %v826_v9 }
  0x48   : > { %v828_v11 = vadd.f32 %v2069_v7, %v827_v10 }
  0x49   : > { %822 = vadd.xlane.f32.xlu0 %v821_v5 }
  0x4a   : > { %v2478_v12 = vsel %vm829_vm2, %v2069_v7, %v828_v11 }
  0xb4   : > { %v820_v13 = vpop.xlane.xlu0 %819 }
  0xb5   : > { %v831_v14 = vmul.f32 %v2478_v12, %v820_v13 }
  0xb7   : > { %v833_v15 = vsub.f32 %v2470_v2, %v831_v14 }
  0xb9   : > { %v835_v16 = vmul.f32 %v833_v15, %v833_v15 }
  0xbb   : > { %v837_v17 = vsel %vm817_vm1, %v835_v16, 0.0 }
  0xbc   : > { %838 = vadd.xlane.f32.xlu1 %v837_v17  ;;  %v823_v18 = vpop.xlane.xlu0 %822 }
  0xbd   : > { %v832_v19 = vmul.f32 %v2478_v12, %v823_v18 }
  0xbf   : > { %v834_v20 = vsub.f32 %v2474_v4, %v832_v19 }
  0xc1   : > { %v836_v21 = vmul.f32 %v834_v20, %v834_v20 }
  0xc3   : > { %v840_v22 = vsel %vm817_vm1, %v836_v21, 0.0 }
  0xc4   : > { %841 = vadd.xlane.f32.xlu1 %v840_v22 }
 0x12f   : > { %v839_v27 = vpop.xlane.xlu1 %838 }
 0x130   : > { %v843_v28 = vmul.f32 %v839_v27, %v2478_v12 }
 0x132   : > { %v845_v29 = vadd.f32 1e-12, %v843_v28 }
 0x134   : > { %2070 = vrsqrt.f32 %v845_v29  ;;  %vm853_vm4 = vweird.f32 %v845_v29 }
 0x137   : > { %v842_v30 = vpop.xlane.xlu1 %841 }
 0x138   : > { %v844_v31 = vmul.f32 %v842_v30, %v2478_v12 }
 0x13a   : > { %v2071_v32 = vpop.eup %2070  ;;  %v846_v33 = vadd.f32 1e-12, %v844_v31 }
 0x13b   : > { %v848_v34 = vmul.f32 %v2071_v32, %v845_v29  ;;  %vm854_vm3 = vweird.f32 %v2071_v32 }
 0x13c   : > { %2072 = vrsqrt.f32 %v846_v33  ;;  %vm855_vm5 = vmor %vm853_vm4, %vm854_vm3  ;;  %vm863_vm7 = vweird.f32 %v846_v33 }
 0x13d   : > { %v849_v35 = vmul.f32 %v2071_v32, %v848_v34 }
 0x13f   : > { %v850_v36 = vmul.f32 0.5, %v849_v35 }
 0x141   : > { %v851_v37 = vsub.f32 1.5, %v850_v36 }
 0x142   : > { %v2073_v38 = vpop.eup %2072 }
 0x143   : > { %v852_v39 = vmul.f32 %v2071_v32, %v851_v37  ;;  %v858_v40 = vmul.f32 %v2073_v38, %v846_v33  ;;  %vm864_vm6 = vweird.f32 %v2073_v38 }
 0x144   : > { %vm865_vm8 = vmor %vm863_vm7, %vm864_vm6 }
 0x145   : > { %v856_v42 = vsel %vm855_vm5, %v2071_v32, %v852_v39  ;;  %v859_v43 = vmul.f32 %v2073_v38, %v858_v40 }
 0x146   : > { %v867_v44 = vmul.f32 %v856_v42, %v833_v15 }
 0x147   : > { %v860_v46 = vmul.f32 0.5, %v859_v43 }
 0x148   : > { %v872_v47 = vmul.f32 %v2060_v41, %v867_v44 }
 0x149   : > { %v861_v48 = vsub.f32 1.5, %v860_v46 }
 0x14a   : > { %v877_v49 = vadd.f32 %v2061_v45, %v872_v47 }
 0x14b   : > { %v862_v50 = vmul.f32 %v2073_v38, %v861_v48 }
 0x14c   : > { %1911 = vmatmul.msk.f32.vlgmr.msra.gmra.mxu0 %vm817_vm1, %v877_v49 }
 0x14d   : > { %v866_v51 = vsel %vm865_vm8, %v2073_v38, %v862_v50 }
 0x14e   : > { %v868_v52 = vmul.f32 %v866_v51, %v834_v20 }
 0x150   : > { %v873_v53 = vmul.f32 %v2060_v41, %v868_v52 }
 0x152   : > { %v878_v54 = vadd.f32 %v2061_v45, %v873_v53 }
 0x154   : > { %1912 = vmatmul.msk.f32.gmra.mxu0 %vm817_vm1, %v878_v54 }
 0x1c9   : > { %v910_v55 = vpop.f32.mrf.mxu0 }
 0x1ca   : > { %v2513_v59 = vadd.f32 %v2062_v56, %v910_v55 }
 0x1d1   : > { %v913_v57 = vpop.f32.mrf.mxu0 }
 0x1d2   : > { %v2509_v58 = vadd.f32 %v2062_v56, %v913_v57 }
 0x1d4   : > { %1020 = vrot.lane.b32.xlu1 %v2509_v58, %s2217_s13  ;;  %920 = vrot.lane.b32.xlu2 %v2509_v58, %s2218_s18  ;;  %v2528_v7 = vpack.i.bf16 %v2513_v59, %v2509_v58 }
 0x1dc   : > { %1016 = vrot.lane.b32.xlu1 %v2509_v58, %s2219_s15  ;;  %918 = vrot.lane.b32.xlu2 %v2513_v59, %s2218_s18 }
 0x22e   : > { %v921_v60 = vpop.permute.xlu2 %920 }
 0x22f   : > { %1913 = vmatpush.xpose.msk.msra.mxu1 %vm922_vm9, %v921_v60 }
 0x236   : > { %v919_v61 = vpop.permute.xlu2 %918 }
 0x237   : > { %1914 = vmatpush.xpose.msk.msra.mxu1 %vm922_vm9, %v919_v61 }
 0x23a   : > { %1915 = vmatmul.msk.f32.vlgmr.msra.gmra.mxu1 %vm922_vm9, %v2513_v59 }
 0x242   : > { %1916 = vmatmul.msk.f32.gmra.mxu1 %vm922_vm9, %v2509_v58 }
 0x246   : > { %v1021_v62 = vpop.permute.xlu1 %1020 }
 0x247   : > { %1951 = vmatpush.xpose.msk.msra.mxu3 %vm922_vm9, %v1021_v62 }
 0x24e   : > { %v1017_v8 = vpop.permute.xlu1 %1016 }
 0x2b7   : > { %v948_v63 = vpop.f32.mrf.mxu1 }
 0x2b8   : > { %v954_v0 = vmul.f32 0.35355338, %v948_v63 }
 0x2ba   : > { %v957_v1 = vsel %vm956_vm10, %v954_v0, -inf }
 0x2bb   : > { %958 = vmax.xlane.f32.xlu0 %v957_v1 }
 0x2bf   : > { %v951_v3 = vpop.f32.mrf.mxu1 }
 0x2c0   : > { %v955_v5 = vmul.f32 0.35355338, %v951_v3 }
 0x2c2   : > { %v960_v6 = vsel %vm956_vm10, %v955_v5, -inf }
 0x2c3   : > { %961 = vmax.xlane.f32.xlu1 %v960_v6 }
 0x2cf   : > { %2041 = vrot.lane.b32.xlu0 %v2528_v7, %s2220_s16 }
 0x2d7   : > { %1018 = vrot.lane.b32.xlu0 %v2513_v59, %s2217_s13  ;;  %s2230_s13 = smov 24  }
 0x2dc   : > { %1210 = vrot.lane.b32.xlu1 %v2513_v59, %s2221_s23 }
 0x2df   : > { %1014 = vrot.lane.b32.xlu0 %v2513_v59, %s2219_s15  ;;  %s2861_s15 = scalar_lea.vmem %s2796_s6, %s2406_s0 }
 0x2e7   : > { %1214 = vrot.lane.b32.xlu0 %v2513_v59, %s2222_s25 }
 0x2ef   : > { %1118 = vrot.lane.b32.xlu0 %v2509_v58, %s2223_s21 }
 0x2f7   : > { %1212 = vrot.lane.b32.xlu0 %v2509_v58, %s2221_s23  ;;  %s2862_s23 = scalar_lea.vmem %s2797_s7, %s2406_s0 }
 0x32e   : > { %v959_v9 = vpop.xlane.xlu0 %958 }
 0x32f   : > { %v963_v10 = vsub.f32 %v954_v0, %v959_v9 }
 0x331   : > { %v965_v11 = vmul.f32 1.442695, %v963_v10 }
 0x333   : > { %2074 = vpow2.f32 %v965_v11 }
 0x336   : > { %v962_v13 = vpop.xlane.xlu1 %961 }
 0x337   : > { %v964_v14 = vsub.f32 %v955_v5, %v962_v13 }
 0x339   : > { %v2075_v15 = vpop.eup %2074  ;;  %v967_v16 = vmul.f32 1.442695, %v964_v14 }
 0x33a   : > { %v969_v17 = vsel %vm956_vm10, %v2075_v15, 0.0 }
 0x33b   : > { %2076 = vpow2.f32 %v967_v16  ;;  %970 = vadd.xlane.f32.xlu2 %v969_v17 }
 0x341   : > { %v2077_v18 = vpop.eup %2076  ;;  %v2042_v19 = vpop.permute.xlu0 %2041 }
 0x342   : > { %v972_v20 = vsel %vm956_vm10, %v2077_v18, 0.0  ;;  %v2043_v21 = vunpack.i.l.bf16 %v2042_v19  ;;  %v2044_v22 = vunpack.i.h.bf16 %v2042_v19 }
 0x343   : > { %973 = vadd.xlane.f32.xlu1 %v972_v20 }
 0x344   : > { %1005 = vmatpush.msra.mxu2 %v2043_v21 }
 0x346   : > { %1006 = vmatpush.msra.mxu2 %v2044_v22 }
 0x348   : > { %1919 = vmatpush.xpose.msk.msrb.mxu2 %vm922_vm9, %v1021_v62 }
 0x349   : > { %v1019_v23 = vpop.permute.xlu0 %1018 }
 0x34a   : > { %1952 = vmatpush.xpose.msk.msra.mxu3 %vm922_vm9, %v1019_v23 }
 0x34c   : > { %1920 = vmatpush.xpose.msk.msrb.mxu2 %vm922_vm9, %v1019_v23 }
 0x34d   : > { %1922 = vmatmul.msk.f32.vlgmr.msra.gmra.mxu3 %vm922_vm9, %v1017_v8 }
 0x34e   : > { %v1211_v27 = vpop.permute.xlu1 %1210 }
 0x351   : > { %v1015_v24 = vpop.permute.xlu0 %1014 }
 0x353   : > { %1216 = vrot.lane.b32.xlu2 %v2509_v58, %s2222_s25 }
 0x359   : > { %v1215_v25 = vpop.permute.xlu0 %1214 }
 0x35b   : > { %1114 = vrot.lane.b32.xlu2 %v2509_v58, %s2224_s24 }
 0x35c   : > { %1116 = vrot.lane.b32.xlu1 %v2513_v59, %s2223_s21 }
 0x361   : > { %v1119_v26 = vpop.permute.xlu0 %1118 }
 0x362   : > { %1925 = vmatpush.xpose.msk.msrb.mxu0 %vm922_vm9, %v1119_v26 }
 0x364   : > { %1112 = vrot.lane.b32.xlu1 %v2513_v59, %s2224_s24 }
 0x369   : > { %v1213_v35 = vpop.permute.xlu0 %1212 }
 0x3ae   : > { %v971_v28 = vpop.xlane.xlu2 %970 }
 0x3af   : > { %2078 = vrcp.f32 %v971_v28 }
 0x3b5   : > { %v2079_v29 = vpop.eup %2078 }
 0x3b6   : > { %v1217_v30 = vpop.permute.xlu2 %1216  ;;  %v974_v31 = vpop.xlane.xlu1 %973  ;;  %v977_v32 = vmul.f32 %v2079_v29, %v2075_v15 }
 0x3b7   : > { %2080 = vrcp.f32 %v974_v31  ;;  %1931 = vmatpush.xpose.msk.msrb.mxu3 %vm922_vm9, %v1217_v30 }
 0x3b8   : > { %1917 = vmatmul.msk.f32.vlgmr.msra.gmra.mxu2 %vm956_vm10, %v977_v32 }
 0x3bb   : > { %1932 = vmatpush.xpose.msk.msrb.mxu3 %vm922_vm9, %v1215_v25 }
 0x3bd   : > { %v2081_v33 = vpop.eup %2080 }
 0x3be   : > { %1933 = vmatmul.msk.f32.vlgmr.msrb.gmra.mxu3 %vm922_vm9, %v1211_v27  ;;  %v978_v34 = vmul.f32 %v2081_v33, %v2077_v18  ;;  %v1115_v41 = vpop.permute.xlu2 %1114 }
 0x3c0   : > { %1918 = vmatmul.msk.f32.gmra.mxu2 %vm956_vm10, %v978_v34 }
 0x3c6   : > { %1934 = vmatmul.msk.f32.gmra.mxu3 %vm922_vm9, %v1213_v35 }
 0x3c8   : > { %1921 = vmatmul.msk.f32.vlgmr.msrb.gmra.mxu2 %vm922_vm9, %v1015_v24 }
 0x3ce   : > { %v1117_v36 = vpop.permute.xlu1 %1116 }
 0x3cf   : > { %1926 = vmatpush.xpose.msk.msrb.mxu0 %vm922_vm9, %v1117_v36 }
 0x3d0   : > { %v1050_v37 = vpop.f32.mrf.mxu3 }
 0x3d1   : > { %v1054_v38 = vmul.f32 0.35355338, %v1050_v37 }
 0x3d3   : > { %v1058_v39 = vsel %vm956_vm10, %v1054_v38, -inf }
 0x3d4   : > { %1059 = vmax.xlane.f32.xlu1 %v1058_v39 }
 0x3d6   : > { %v1113_v40 = vpop.permute.xlu1 %1112 }
 0x3d7   : > { %1927 = vmatmul.msk.f32.vlgmr.msrb.gmra.mxu0 %vm922_vm9, %v1113_v40 }
 0x3df   : > { %1928 = vmatmul.msk.f32.gmra.mxu0 %vm922_vm9, %v1115_v41 }
 0x43b   : > { %v2563_v42 = vpop.f32.mrf.mxu2 }
 0x441   : > { %v1243_v43 = vpop.f32.mrf.mxu3 }
 0x442   : > { %v1249_v44 = vmul.f32 0.35355338, %v1243_v43 }
 0x443   : > { %v2565_v45 = vpop.f32.mrf.mxu2 }
 0x444   : > { %v1251_v46 = vsel %vm956_vm10, %v1249_v44, -inf }
 0x445   : > { %1252 = vmax.xlane.f32.xlu2 %v1251_v46 }
 0x447   : > { %v1060_v53 = vpop.xlane.xlu1 %1059 }
 0x448   : > { %v1062_v56 = vsub.f32 %v1054_v38, %v1060_v53 }
 0x449   : > { %v1246_v47 = vpop.f32.mrf.mxu3 }
 0x44a   : > { %v1250_v48 = vmul.f32 0.35355338, %v1246_v47  ;;  %v1065_v58 = vmul.f32 1.442695, %v1062_v56 }
 0x44b   : > { %v1047_v49 = vpop.f32.mrf.mxu2 }
 0x44c   : > { %v1053_v50 = vmul.f32 0.35355338, %v1047_v49  ;;  %v1254_v51 = vsel %vm956_vm10, %v1250_v48, -inf  ;;  %2082 = vpow2.f32 %v1065_v58 }
 0x44d   : > { %1255 = vmax.xlane.f32.xlu2 %v1254_v51 }
 0x44e   : > { %v1055_v52 = vsel %vm956_vm10, %v1053_v50, -inf }
 0x44f   : > { %1056 = vmax.xlane.f32.xlu0 %v1055_v52 }
 0x452   : > { %v2572_v62 = vpop.eup %2082 }
 0x453   : > { %v1070_v63 = vsel %vm956_vm10, %v2572_v62, 0.0 }
 0x454   : > { %v1145_v54 = vpop.f32.mrf.mxu0 }
 0x455   : > { %v1151_v55 = vmul.f32 0.35355338, %v1145_v54 }
 0x457   : > { %v1153_v57 = vsel %vm956_vm10, %v1151_v55, -inf }
 0x458   : > { %1154 = vmax.xlane.f32.xlu0 %v1153_v57 }
 0x45c   : > { %v1148_v59 = vpop.f32.mrf.mxu0 }
 0x45d   : > { %v1152_v60 = vmul.f32 0.35355338, %v1148_v59 }
 0x45f   : > { %v1156_v61 = vsel %vm956_vm10, %v1152_v60, -inf }
 0x460   : > { %1157 = vmax.xlane.f32.xlu1 %v1156_v61 }
 0x465   : > { %2046 = vrot.lane.b32.xlu2 %v2528_v7, %s2225_s2  ;;  %s2863_s2 = sld [smem:[#allocation8_spill]] }
 0x468   : > { %1071 = vadd.xlane.f32.xlu1 %v1070_v63  ;;  %v1342_v63 = vld [vmem:[%s2432_s29 + $0x18] sm:$0xff] }
 0x469   : > { %1361 = vmatpush.msra.mxu0 %v1342_v63 }
 0x46b   : > { %p1941_p1 = scmp.ne.s32.totalorder %s2863_s2, 1 }
 0x46d   : > { %2056 = vrot.lane.b32.xlu2 %v2528_v7, %s2226_s20  ;;  %s2864_s20 = sld [smem:[#allocation24_spill]] (!%p1941_p1) }
 0x4b8   : > { %v1253_v0 = vpop.xlane.xlu2 %1252 }
 0x4b9   : > { %v1257_v1 = vsub.f32 %v1249_v44, %v1253_v0  ;;  %v1341_v0 = vld [vmem:[%s2432_s29 + $0x10] sm:$0xff] }
 0x4ba   : > { %1362 = vmatpush.msra.mxu0 %v1341_v0 }
 0x4bb   : > { %v1259_v3 = vmul.f32 1.442695, %v1257_v1  ;;  %v1340_v1 = vld [vmem:[%s2432_s29 + $0x8] sm:$0xff] }
 0x4bc   : > { %1363 = vmatpush.msra.mxu0 %v1340_v1 }
 0x4bd   : > { %2084 = vpow2.f32 %v1259_v3  ;;  %v1339_v3 = vld [vmem:[%s2432_s29] sm:$0xff]  ;;  %s2868_s29 = sld [smem:[#allocation22_spill]] (!%p1941_p1) }
 0x4be   : > { %1364 = vmatpush.msra.mxu0 %v1339_v3 }
 0x4c0   : > { %v1256_v5 = vpop.xlane.xlu2 %1255 }
 0x4c1   : > { %v1258_v19 = vsub.f32 %v1250_v48, %v1256_v5 }
 0x4c2   : > { %v1057_v6 = vpop.xlane.xlu0 %1056 }
 0x4c3   : > { %v2578_v8 = vpop.eup %2084  ;;  %v1061_v9 = vsub.f32 %v1053_v50, %v1057_v6  ;;  %v1261_v24 = vmul.f32 1.442695, %v1258_v19 }
 0x4c4   : > { %v1263_v10 = vsel %vm956_vm10, %v2578_v8, 0.0 }
 0x4c5   : > { %v1063_v11 = vmul.f32 1.442695, %v1061_v9  ;;  %1264 = vadd.xlane.f32.xlu0 %v1263_v10 }
 0x4c7   : > { %2086 = vpow2.f32 %v1063_v11 }
 0x4c8   : > { %v2047_v13 = vpop.permute.xlu2 %2046 }
 0x4c9   : > { %v2048_v14 = vunpack.i.l.bf16 %v2047_v13  ;;  %v2049_v15 = vunpack.i.h.bf16 %v2047_v13 }
 0x4cb   : > { %1103 = vmatpush.msra.mxu2 %v2048_v14  ;;  %v1155_v16 = vpop.xlane.xlu0 %1154 }
 0x4cc   : > { %v1159_v17 = vsub.f32 %v1151_v55, %v1155_v16 }
 0x4cd   : > { %v2087_v18 = vpop.eup %2086  ;;  %1104 = vmatpush.msra.mxu2 %v2049_v15 }
 0x4ce   : > { %v1161_v20 = vmul.f32 1.442695, %v1159_v17  ;;  %v1067_v21 = vsel %vm956_vm10, %v2087_v18, 0.0 }
 0x4cf   : > { %1068 = vadd.xlane.f32.xlu0 %v1067_v21 }
 0x4d0   : > { %2088 = vpow2.f32 %v1161_v20  ;;  %v2057_v22 = vpop.permute.xlu2 %2056 }
 0x4d1   : > { %v2058_v23 = vunpack.i.l.bf16 %v2057_v22  ;;  %v2059_v26 = vunpack.i.h.bf16 %v2057_v22  ;;  %2090 = vpow2.f32 %v1261_v24 }
 0x4d3   : > { %1201 = vmatpush.msrb.mxu1 %v2058_v23  ;;  %v1158_v25 = vpop.xlane.xlu1 %1157 }
 0x4d4   : > { %v1160_v28 = vsub.f32 %v1152_v60, %v1158_v25 }
 0x4d5   : > { %1202 = vmatpush.msrb.mxu1 %v2059_v26 }
 0x4d6   : > { %v2089_v27 = vpop.eup %2088  ;;  %v1163_v30 = vmul.f32 1.442695, %v1160_v28 }
 0x4d7   : > { %v1165_v29 = vsel %vm956_vm10, %v2089_v27, 0.0  ;;  %v2091_v31 = vpop.eup %2090 }
 0x4d8   : > { %1166 = vadd.xlane.f32.xlu1 %v1165_v29  ;;  %2092 = vpow2.f32 %v1163_v30  ;;  %v1266_v32 = vsel %vm956_vm10, %v2091_v31, 0.0 }
 0x4db   : > { %v1072_v37 = vpop.xlane.xlu1 %1071 }
 0x4de   : > { %v2093_v33 = vpop.eup %2092 }
 0x4df   : > { %v1168_v34 = vsel %vm956_vm10, %v2093_v33, 0.0 }
 0x4e0   : > { %1267 = vadd.xlane.f32.xlu1 %v1266_v32 }
 0x4e3   : > { %2051 = vrot.lane.b32.xlu0 %v2528_v7, %s2227_s3  ;;  %s2865_s3 = smov (!%p1941_p1), %s2864_s20 }
 0x4e8   : > { %1169 = vadd.xlane.f32.xlu1 %v1168_v34  ;;  %v1439_v34 = vld [vmem:[%s2449_s22 + $0x18] sm:$0xff] }
 0x4e9   : > { %1462 = vmatpush.msra.mxu1 %v1439_v34 }
 0x538   : > { %v1265_v35 = vpop.xlane.xlu0 %1264 }
 0x542   : > { %v1069_v36 = vpop.xlane.xlu0 %1068 }
 0x543   : > { %2094 = vrcp.f32 %v1069_v36  ;;  %v1437_v36 = vld [vmem:[%s2449_s22 + $0x8] sm:$0xff] }
 0x544   : > { %2096 = vrcp.f32 %v1072_v37  ;;  %v1436_v37 = vld [vmem:[%s2449_s22] sm:$0xff] }
 0x549   : > { %v2095_v38 = vpop.eup %2094 }
 0x54a   : > { %v1075_v39 = vmul.f32 %v2095_v38, %v2087_v18  ;;  %v2097_v41 = vpop.eup %2096 }
 0x54b   : > { %v1167_v40 = vpop.xlane.xlu1 %1166  ;;  %v1076_v7 = vmul.f32 %v2097_v41, %v2572_v62 }
 0x54c   : > { %2098 = vrcp.f32 %v1167_v40  ;;  %1923 = vmatmul.msk.f32.vlgmr.msra.gmra.mxu2 %vm956_vm10, %v1075_v39 }
 0x54d   : > { %2100 = vrcp.f32 %v1265_v35  ;;  %v1438_v35 = vld [vmem:[%s2449_s22 + $0x10] sm:$0xff]  ;;  %s2869_s22 = sld [smem:[#allocation23_spill]] (!%p1941_p1) }
 0x54e   : > { %1463 = vmatpush.msra.mxu1 %v1438_v35 }
 0x550   : > { %1464 = vmatpush.msra.mxu1 %v1437_v36  ;;  %v1554_v36 = vld [vmem:[%s2463_s28 + $0x8] sm:$0xff] }
 0x552   : > { %v2099_v43 = vpop.eup %2098  ;;  %1465 = vmatpush.msra.mxu1 %v1436_v37 }
 0x553   : > { %v1268_v44 = vpop.xlane.xlu1 %1267  ;;  %v1173_v46 = vmul.f32 %v2099_v43, %v2089_v27  ;;  %v2101_v49 = vpop.eup %2100 }
 0x554   : > { %1924 = vmatmul.msk.f32.gmra.mxu2 %vm956_vm10, %v1076_v7  ;;  %2102 = vrcp.f32 %v1268_v44  ;;  %v1271_v51 = vmul.f32 %v2101_v49, %v2578_v8 }
 0x555   : > { %v2052_v47 = vpop.permute.xlu0 %2051  ;;  %1929 = vmatmul.msk.f32.vlgmr.msrb.gmra.mxu1 %vm956_vm10, %v1173_v46 }
 0x556   : > { %v2053_v48 = vunpack.i.l.bf16 %v2052_v47  ;;  %v2054_v50 = vunpack.i.h.bf16 %v2052_v47 }
 0x558   : > { %1299 = vmatpush.msrb.mxu2 %v2053_v48 }
 0x55a   : > { %1300 = vmatpush.msrb.mxu2 %v2054_v50  ;;  %v2103_v53 = vpop.eup %2102 }
 0x55b   : > { %v1170_v52 = vpop.xlane.xlu1 %1169  ;;  %v1272_v55 = vmul.f32 %v2103_v53, %v2091_v31  ;;  %v2064_v53 = vld [vmem:[%s2862_s23] ss:$0 sm:$0xff]  ;;  %s2866_s23 = sld [smem:[#allocation26_spill]] (!%p1941_p1) }
 0x55c   : > { %2104 = vrcp.f32 %v1170_v52  ;;  %1935 = vmatmul.msk.f32.vlgmr.msrb.gmra.mxu2 %vm956_vm10, %v1271_v51 }
 0x561   : > { %s2867_s25 = smov (!%p1941_p1), %s2866_s23 }
 0x562   : > { %v2105_v54 = vpop.eup %2104 }
 0x563   : > { %v1174_v56 = vmul.f32 %v2105_v54, %v2093_v33 }
 0x564   : > { %1936 = vmatmul.msk.f32.gmra.mxu2 %vm956_vm10, %v1272_v55 }
 0x565   : > { %1930 = vmatmul.msk.f32.gmra.mxu1 %vm956_vm10, %v1174_v56 }
 0x5cf   : > { %v1106_v57 = vpop.f32.mrf.mxu2 }
 0x5d0   : > { %1310 = vrot.lane.b32.xlu0 %v1106_v57, %s2228_s1  ;;  %v2065_v57 = vld [vmem:[%s787_s17] ss:$0 sm:$0xff] }
 0x5d2   : > { %v1204_v58 = vpop.f32.mrf.mxu1 }
 0x5d3   : > { %1318 = vrot.lane.b32.xlu2 %v1204_v58, %s2229_s27 }
 0x5d7   : > { %v1109_v59 = vpop.f32.mrf.mxu2 }
 0x5d8   : > { %1312 = vrot.lane.b32.xlu0 %v1109_v59, %s2228_s1 }
 0x5df   : > { %v1302_v60 = vpop.f32.mrf.mxu2 }
 0x5e0   : > { %1326 = vrot.lane.b32.xlu1 %v1302_v60, %s2230_s13 }
 0x5e2   : > { %v1207_v61 = vpop.f32.mrf.mxu1 }
 0x5e3   : > { %1320 = vrot.lane.b32.xlu2 %v1207_v61, %s2229_s27 }
 0x5e7   : > { %v1305_v62 = vpop.f32.mrf.mxu2 }
 0x5e8   : > { %1328 = vrot.lane.b32.xlu0 %v1305_v62, %s2230_s13 }
 0x62d   : > { %v1319_v8 = vpop.permute.xlu2 %1318 }
 0x63d   : > { %v1321_v15 = vpop.permute.xlu2 %1320 }
 0x642   : > { %v1311_v5 = vpop.permute.xlu0 %1310 }
 0x643   : > { %v1332_v6 = vsel %vm922_vm9, %v2563_v42, %v1311_v5  ;;  %v2063_v42 = vld [vmem:[%s2861_s15] ss:$0 sm:$0xff]  ;;  %v1568_v5 = vld [vmem:[%s2463_s28 + $0x78] sm:$0xff] }
 0x644   : > { %v1334_v10 = vsel %vm956_vm10, %v1332_v6, %v1319_v8  ;;  %1569 = vmatpush.msra.mxu3 %v1568_v5  ;;  %v1567_v6 = vld [vmem:[%s2463_s28 + $0x70] sm:$0xff]  ;;  %v2066_v8 = vld [vmem:[%s795_s26] ss:$0 sm:$0xff] }
 0x646   : > { %1570 = vmatpush.msra.mxu3 %v1567_v6 }
 0x64a   : > { %v1313_v9 = vpop.permute.xlu0 %1312 }
 0x64b   : > { %v1333_v14 = vsel %vm922_vm9, %v2565_v45, %v1313_v9  ;;  %v1566_v9 = vld [vmem:[%s2463_s28 + $0x68] sm:$0xff] }
 0x64c   : > { %v1335_v17 = vsel %vm956_vm10, %v1333_v14, %v1321_v15  ;;  %1571 = vmatpush.msra.mxu3 %v1566_v9  ;;  %v1564_v14 = vld [vmem:[%s2463_s28 + $0x58] sm:$0xff] }
 0x652   : > { %v1327_v11 = vpop.permute.xlu1 %1326 }
 0x653   : > { %v1337_v13 = vsel %vm1336_vm11, %v1334_v10, %v1327_v11  ;;  %v1565_v10 = vld [vmem:[%s2463_s28 + $0x60] sm:$0xff] }
 0x654   : > { %1937 = vmatmul.msk.f32.vlgmr.msra.gmra.mxu0 %vm817_vm1, %v1337_v13  ;;  %1572 = vmatpush.msra.mxu3 %v1565_v10 }
 0x656   : > { %1573 = vmatpush.msra.mxu3 %v1564_v14 }
 0x65a   : > { %v1329_v16 = vpop.permute.xlu0 %1328 }
 0x65b   : > { %v1338_v18 = vsel %vm1336_vm11, %v1335_v17, %v1329_v16  ;;  %v1563_v16 = vld [vmem:[%s2463_s28 + $0x50] sm:$0xff] }
 0x65c   : > { %1938 = vmatmul.msk.f32.gmra.mxu0 %vm817_vm1, %v1338_v18  ;;  %1574 = vmatpush.msra.mxu3 %v1563_v16  ;;  %v1562_v18 = vld [vmem:[%s2463_s28 + $0x48] sm:$0xff] }
 0x65e   : > { %1575 = vmatpush.msra.mxu3 %v1562_v18 }
 0x6d1   : > { %v1366_v19 = vpop.f32.mrf.mxu0 }
 0x6d2   : > { %v1372_v20 = vadd.f32 %v1366_v19, %v2470_v2  ;;  %v1561_v19 = vld [vmem:[%s2463_s28 + $0x40] sm:$0xff] }
 0x6d3   : > { %1576 = vmatpush.msra.mxu3 %v1561_v19 }
 0x6d4   : > { %v2613_v21 = vadd.f32 %v2063_v42, %v1372_v20 }
 0x6d6   : > { %v1382_v45 = vsel %vm817_vm1, %v2613_v21, 0.0 }
 0x6d7   : > { %1383 = vadd.xlane.f32.xlu2 %v1382_v45 }
 0x6d9   : > { %v1369_v22 = vpop.f32.mrf.mxu0 }
 0x6da   : > { %v1373_v23 = vadd.f32 %v1369_v22, %v2474_v4 }
 0x6dc   : > { %v2618_v24 = vadd.f32 %v2063_v42, %v1373_v23  ;;  %v1560_v23 = vld [vmem:[%s2463_s28 + $0x38] sm:$0xff] }
 0x6dd   : > { %1577 = vmatpush.msra.mxu3 %v1560_v23 }
 0x6de   : > { %v1385_v25 = vsel %vm817_vm1, %v2618_v24, 0.0 }
 0x6df   : > { %1386 = vadd.xlane.f32.xlu0 %v1385_v25  ;;  %v1559_v25 = vld [vmem:[%s2463_s28 + $0x30] sm:$0xff] }
 0x6e0   : > { %1578 = vmatpush.msra.mxu3 %v1559_v25 }
 0x74a   : > { %v1384_v26 = vpop.xlane.xlu2 %1383 }
 0x74b   : > { %v1388_v2 = vmul.f32 %v1384_v26, %v2478_v12 }
 0x74d   : > { %v1390_v27 = vsub.f32 %v2613_v21, %v1388_v2  ;;  %v1558_v2 = vld [vmem:[%s2463_s28 + $0x28] sm:$0xff] }
 0x74e   : > { %1579 = vmatpush.msra.mxu3 %v1558_v2 }
 0x74f   : > { %v1392_v28 = vmul.f32 %v1390_v27, %v1390_v27 }
 0x751   : > { %v1394_v29 = vsel %vm817_vm1, %v1392_v28, 0.0  ;;  %v1557_v28 = vld [vmem:[%s2463_s28 + $0x20] sm:$0xff] }
 0x752   : > { %1395 = vadd.xlane.f32.xlu1 %v1394_v29  ;;  %v1387_v4 = vpop.xlane.xlu0 %1386  ;;  %1580 = vmatpush.msra.mxu3 %v1557_v28 }
 0x753   : > { %v1389_v30 = vmul.f32 %v1387_v4, %v2478_v12 }
 0x755   : > { %v1391_v31 = vsub.f32 %v2618_v24, %v1389_v30  ;;  %v1556_v30 = vld [vmem:[%s2463_s28 + $0x18] sm:$0xff] }
 0x756   : > { %1581 = vmatpush.msra.mxu3 %v1556_v30 }
 0x757   : > { %v1393_v32 = vmul.f32 %v1391_v31, %v1391_v31 }
 0x759   : > { %v1397_v33 = vsel %vm817_vm1, %v1393_v32, 0.0 }
 0x75a   : > { %1398 = vadd.xlane.f32.xlu2 %v1397_v33  ;;  %v1555_v33 = vld [vmem:[%s2463_s28 + $0x10] sm:$0xff] }
 0x75b   : > { %1582 = vmatpush.msra.mxu3 %v1555_v33 }
 0x75d   : > { %1583 = vmatpush.msra.mxu3 %v1554_v36 }
 0x7c5   : > { %v1396_v38 = vpop.xlane.xlu1 %1395 }
 0x7c6   : > { %v1400_v39 = vmul.f32 %v1396_v38, %v2478_v12 }
 0x7c8   : > { %v1402_v40 = vadd.f32 1e-12, %v1400_v39  ;;  %v1553_v39 = vld [vmem:[%s2463_s28] sm:$0xff]  ;;  %s2870_s28 = sld [smem:[#allocation25_spill]] (!%p1941_p1) }
 0x7c9   : > { %1584 = vmatpush.msra.mxu3 %v1553_v39 }
 0x7ca   : > { %2106 = vrsqrt.f32 %v1402_v40  ;;  %vm1410_vm13 = vweird.f32 %v1402_v40 }
 0x7cd   : > { %v1399_v41 = vpop.xlane.xlu2 %1398 }
 0x7ce   : > { %v1401_v43 = vmul.f32 %v1399_v41, %v2478_v12 }
 0x7d0   : > { %v2107_v7 = vpop.eup %2106  ;;  %v1403_v44 = vadd.f32 1e-12, %v1401_v43 }
 0x7d1   : > { %v1405_v46 = vmul.f32 %v2107_v7, %v1402_v40  ;;  %vm1411_vm12 = vweird.f32 %v2107_v7 }
 0x7d2   : > { %2108 = vrsqrt.f32 %v1403_v44  ;;  %vm1412_vm14 = vmor %vm1410_vm13, %vm1411_vm12  ;;  %vm1420_vm0 = vweird.f32 %v1403_v44 }
 0x7d3   : > { %v1406_v47 = vmul.f32 %v2107_v7, %v1405_v46 }
 0x7d5   : > { %v1407_v48 = vmul.f32 0.5, %v1406_v47 }
 0x7d7   : > { %v1408_v49 = vsub.f32 1.5, %v1407_v48 }
 0x7d8   : > { %v2109_v50 = vpop.eup %2108 }
 0x7d9   : > { %v1409_v51 = vmul.f32 %v2107_v7, %v1408_v49  ;;  %v1415_v52 = vmul.f32 %v2109_v50, %v1403_v44  ;;  %vm1421_vm15 = vweird.f32 %v2109_v50 }
 0x7da   : > { %vm1422_vm2 = vmor %vm1420_vm0, %vm1421_vm15 }
 0x7db   : > { %v1413_v54 = vsel %vm1412_vm14, %v2107_v7, %v1409_v51  ;;  %v1416_v55 = vmul.f32 %v2109_v50, %v1415_v52 }
 0x7dc   : > { %v1424_v56 = vmul.f32 %v1413_v54, %v1390_v27 }
 0x7dd   : > { %v1417_v58 = vmul.f32 0.5, %v1416_v55 }
 0x7de   : > { %v1429_v59 = vmul.f32 %v2064_v53, %v1424_v56 }
 0x7df   : > { %v1418_v60 = vsub.f32 1.5, %v1417_v58 }
 0x7e0   : > { %v1434_v61 = vadd.f32 %v2065_v57, %v1429_v59 }
 0x7e1   : > { %v1419_v62 = vmul.f32 %v2109_v50, %v1418_v60 }
 0x7e2   : > { %1939 = vmatmul.msk.f32.vlgmr.msra.gmra.mxu1 %vm817_vm1, %v1434_v61 }
 0x7e3   : > { %v1423_v63 = vsel %vm1422_vm2, %v2109_v50, %v1419_v62 }
 0x7e4   : > { %v1425_v0 = vmul.f32 %v1423_v63, %v1391_v31 }
 0x7e6   : > { %v1430_v1 = vmul.f32 %v2064_v53, %v1425_v0 }
 0x7e8   : > { %v1435_v3 = vadd.f32 %v2065_v57, %v1430_v1 }
 0x7ea   : > { %1940 = vmatmul.msk.f32.gmra.mxu1 %vm817_vm1, %v1435_v3 }
 0x85f   : > { %v1467_v11 = vpop.f32.mrf.mxu1 }
 0x860   : > { %v2655_v13 = vadd.f32 %v2066_v8, %v1467_v11 }
 0x862   : > { %v2659_v15 = vmul.f32 0.70710677, %v2655_v13 }
 0x864   : > { %v1481_v17 = vand.u32 2147483647, %v2659_v15  ;;  %vm1477_vm11 = vcmp.ge.f32.partialorder %v2659_v15, 0.0 }
 0x866   : > { %v1483_v42 = vmul.f32 0.3275911, %v1481_v17  ;;  %v1535_v46 = vsub.f32 0.0, %v1481_v17 }
 0x867   : > { %v1470_v20 = vpop.f32.mrf.mxu1 }
 0x868   : > { %v1485_v45 = vadd.f32 1.0, %v1483_v42  ;;  %v2665_v22 = vadd.f32 %v2066_v8, %v1470_v20  ;;  %v1537_v52 = vmul.f32 %v1535_v46, %v1481_v17  ;;  %v2231_v20 = vmov -1.0  }
 0x86a   : > { %2110 = vrcp.f32 %v1485_v45  ;;  %v2670_v26 = vmul.f32 0.70710677, %v2665_v22  ;;  %v1498_v35 = vand.u32 2147483648, %v1485_v45  ;;  %v1496_v38 = vand.u32 2147483647, %v1485_v45 }
 0x86b   : > { %vm1492_vm4 = vweird.f32 %v1485_v45  ;;  %v1539_v59 = vmul.f32 1.442695, %v1537_v52 }
 0x86c   : > { %v1482_v27 = vand.u32 2147483647, %v2670_v26  ;;  %v1499_v41 = vor.u32 1.1754944e-38, %v1498_v35  ;;  %vm1497_vm6 = vcmp.eq.f32.partialorder %v1496_v38, 8.507059e+37  ;;  %vm1478_vm12 = vcmp.ge.f32.partialorder %v2670_v26, 0.0 }
 0x86e   : > { %v1484_v29 = vmul.f32 0.3275911, %v1482_v27  ;;  %v1536_v62 = vsub.f32 0.0, %v1482_v27 }
 0x870   : > { %v2111_v4 = vpop.eup %2110  ;;  %v1486_v32 = vadd.f32 1.0, %v1484_v29  ;;  %v1538_v6 = vmul.f32 %v1536_v62, %v1482_v27  ;;  %v1473_v27 = vmul.f32 0.5, %v2655_v13  ;;  %v2067_v13 = vld [vmem:[%s803_s19] ss:$0 sm:$0xff]  ;;  %s2871_s19 = sld [smem:[#allocation27_spill]] (!%p1941_p1) }
 0x871   : > { %v1488_v31 = vmul.f32 %v2111_v4, %v1485_v45  ;;  %vm1493_vm3 = vweird.f32 %v2111_v4  ;;  %v1479_v45 = vsel %vm1477_vm11, 1.0, %v2231_v20 }
 0x872   : > { %2112 = vrcp.f32 %v1486_v32  ;;  %vm1494_vm5 = vmor %vm1492_vm4, %vm1493_vm3  ;;  %v1513_v51 = vand.u32 2147483648, %v1486_v32  ;;  %v1511_v54 = vand.u32 2147483647, %v1486_v32  ;;  %vm1507_vm8 = vweird.f32 %v1486_v32 }
 0x873   : > { %v1489_v34 = vsub.f32 1.0, %v1488_v31  ;;  %2114 = vpow2.f32 %v1539_v59  ;;  %v1541_v14 = vmul.f32 1.442695, %v1538_v6 }
 0x874   : > { %v1514_v58 = vor.u32 1.1754944e-38, %v1513_v51  ;;  %vm1512_vm10 = vcmp.eq.f32.partialorder %v1511_v54, 8.507059e+37 }
 0x875   : > { %v1490_v37 = vmul.f32 %v2111_v4, %v1489_v34  ;;  %2116 = vpow2.f32 %v1541_v14  ;;  %v1474_v34 = vmul.f32 0.5, %v2665_v22 }
 0x877   : > { %v1491_v40 = vadd.f32 %v2111_v4, %v1490_v37 }
 0x878   : > { %v2113_v43 = vpop.eup %2112 }
 0x879   : > { %v1495_v7 = vsel %vm1494_vm5, %v2111_v4, %v1491_v40  ;;  %v1503_v47 = vmul.f32 %v2113_v43, %v1486_v32  ;;  %vm1508_vm7 = vweird.f32 %v2113_v43  ;;  %v2115_v16 = vpop.eup %2114  ;;  %v1480_v32 = vsel %vm1478_vm12, 1.0, %v2231_v20 }
 0x87a   : > { %v1500_v44 = vsel %vm1497_vm6, %v1499_v41, %v1495_v7  ;;  %vm1509_vm9 = vmor %vm1507_vm8, %vm1508_vm7 }
 0x87b   : > { %v1517_v48 = vmul.f32 1.0614054, %v1500_v44  ;;  %v1504_v49 = vsub.f32 1.0, %v1503_v47  ;;  %v2117_v4 = vpop.eup %2116 }
 0x87d   : > { %v1519_v50 = vadd.f32 -1.4531521, %v1517_v48  ;;  %v1505_v53 = vmul.f32 %v2113_v43, %v1504_v49 }
 0x87f   : > { %v1521_v55 = vmul.f32 %v1519_v50, %v1500_v44  ;;  %v1506_v56 = vadd.f32 %v2113_v43, %v1505_v53 }
 0x881   : > { %v1523_v57 = vadd.f32 1.4214138, %v1521_v55  ;;  %v1510_v60 = vsel %vm1509_vm9, %v2113_v43, %v1506_v56 }
 0x882   : > { %v1515_v63 = vsel %vm1512_vm10, %v1514_v58, %v1510_v60 }
 0x883   : > { %v1525_v61 = vmul.f32 %v1523_v57, %v1500_v44  ;;  %v1518_v0 = vmul.f32 1.0614054, %v1515_v63 }
 0x885   : > { %v1527_v1 = vadd.f32 -0.28449672, %v1525_v61  ;;  %v1520_v3 = vadd.f32 -1.4531521, %v1518_v0 }
 0x887   : > { %v1529_v5 = vmul.f32 %v1527_v1, %v1500_v44  ;;  %v1522_v8 = vmul.f32 %v1520_v3, %v1515_v63 }
 0x889   : > { %v1531_v9 = vadd.f32 0.2548296, %v1529_v5  ;;  %v1524_v10 = vadd.f32 1.4214138, %v1522_v8 }
 0x88b   : > { %v1533_v11 = vmul.f32 %v1531_v9, %v1500_v44  ;;  %v1526_v17 = vmul.f32 %v1524_v10, %v1515_v63 }
 0x88d   : > { %v1543_v18 = vmul.f32 %v2115_v16, %v1533_v11  ;;  %v1528_v42 = vadd.f32 -0.28449672, %v1526_v17 }
 0x88f   : > { %v1545_v19 = vsub.f32 1.0, %v1543_v18  ;;  %v1530_v23 = vmul.f32 %v1528_v42, %v1515_v63 }
 0x891   : > { %v1547_v25 = vmul.f32 %v1545_v19, %v1479_v45  ;;  %v1532_v2 = vadd.f32 0.2548296, %v1530_v23 }
 0x893   : > { %v1549_v28 = vadd.f32 1.0, %v1547_v25  ;;  %v1534_v29 = vmul.f32 %v1532_v2, %v1515_v63 }
 0x895   : > { %v1551_v30 = vmul.f32 %v1549_v28, %v1473_v27  ;;  %v1544_v31 = vmul.f32 %v2117_v4, %v1534_v29 }
 0x897   : > { %1585 = vmatmul.f32.vlgmr.msra.gmra.mxu3 %v1551_v30  ;;  %v1546_v15 = vsub.f32 1.0, %v1544_v31 }
 0x899   : > { %v1548_v33 = vmul.f32 %v1546_v15, %v1480_v32 }
 0x89b   : > { %v1550_v35 = vadd.f32 1.0, %v1548_v33 }
 0x89d   : > { %v1552_v36 = vmul.f32 %v1550_v35, %v1474_v34 }
 0x89f   : > { %1588 = vmatmul.f32.gmra.mxu3 %v1552_v36 }
 0x91a   : > { %v1586_v37 = vpop.f32.mrf.mxu3 }
 0x91b   : > { %v1592_v38 = vadd.f32 %v1586_v37, %v2613_v21 }
 0x91d   : > { %v1598_v39 = vadd.f32 %v2067_v13, %v1592_v38 }
 0x91f   : > { %1600 = vst.msk [vmem:[#allocation2] sm:$0xff] %vm817_vm1, %v1598_v39 }
 0x922   : > { %v1589_v26 = vpop.f32.mrf.mxu3 }
 0x923   : > { %v1593_v40 = vadd.f32 %v1589_v26, %v2618_v24  ;;  %1605 = sbr.rel (%p1941_p1) target bundleno = 2870 (0xb36), region = 104 }
 0x925   : > { %v1599_v41 = vadd.f32 %v2067_v13, %v1593_v40 }
 0x927   : > { %1601 = vst.msk [vmem:[#allocation2 + $0x8] sm:$0xff] %vm817_vm1, %v1599_v41 }
 0x928   : > { %vm1608_vm13 = vcmask 253952   ;;  %v1636_v24 = vld [vmem:[%s2864_s20 + $0x18] sm:$0xff]  ;;  %v1635_v47 = vld [vmem:[%s2865_s3 + $0x10] sm:$0xff]  ;;  %v1634_v48 = vld [vmem:[%s2865_s3 + $0x8] sm:$0xff]  ;;  %vm1670_vm2 = vcmask 523264  }
 0x929   : > { %v1609_v22 = vsel %vm1608_vm13, %v1598_v39, 0.0  ;;  %1653 = vmatpush.msra.mxu0 %v1636_v24  ;;  %v1633_v49 = vld [vmem:[%s2865_s3] sm:$0xff]  ;;  %v1668_v50 = vld [vmem:[%s2866_s23 + $0x38] sm:$0xff]  ;;  %v1667_v51 = vld [vmem:[%s2867_s25 + $0x30] sm:$0xff] }
 0x92a   : > { %1610 = vadd.xlane.f32.xlu0 %v1609_v22  ;;  %1682 = vmatpush.msra.mxu1 %v1668_v50  ;;  %v1666_v52 = vld [vmem:[%s2867_s25 + $0x28] sm:$0xff]  ;;  %v1665_v55 = vld [vmem:[%s2867_s25 + $0x20] sm:$0xff]  ;;  %v1664_v57 = vld [vmem:[%s2867_s25 + $0x18] sm:$0xff] }
 0x92b   : > { %1654 = vmatpush.msra.mxu0 %v1635_v47  ;;  %v1663_v58 = vld [vmem:[%s2867_s25 + $0x10] sm:$0xff]  ;;  %v1606_v0 = vld [vmem:[%s2868_s29] sm:$0x1]  ;;  %v1662_v9 = vld [vmem:[%s2867_s25 + $0x8] sm:$0xff] }
 0x92c   : > { %1683 = vmatpush.msra.mxu1 %v1667_v51  ;;  %v1607_v5 = vld [vmem:[%s2869_s22] sm:$0x1] }
 0x92d   : > { %1655 = vmatpush.msra.mxu0 %v1634_v48  ;;  %v1661_v10 = vld [vmem:[%s2867_s25] sm:$0xff] }
 0x92e   : > { %1684 = vmatpush.msra.mxu1 %v1666_v52  ;;  %v1637_v11 = vld [vmem:[%s2870_s28] sm:$0x1] }
 0x92f   : > { %1656 = vmatpush.msra.mxu0 %v1633_v49  ;;  %v1669_v17 = vld [vmem:[%s2871_s19] sm:$0x1] }
 0x930   : > { %1685 = vmatpush.msra.mxu1 %v1665_v55 }
 0x932   : > { %1686 = vmatpush.msra.mxu1 %v1664_v57 }
 0x934   : > { %1687 = vmatpush.msra.mxu1 %v1663_v58 }
 0x936   : > { %1688 = vmatpush.msra.mxu1 %v1662_v9 }
 0x938   : > { %1689 = vmatpush.msra.mxu1 %v1661_v10 }
 0x99d   : > { %v1611_v43 = vpop.xlane.xlu0 %1610 }
 0x99e   : > { %v1612_v7 = vmul.f32 %v1611_v43, %v2478_v12 }
 0x9a0   : > { %v1613_v44 = vsub.f32 %v1598_v39, %v1612_v7 }
 0x9a2   : > { %v1614_v21 = vmul.f32 %v1613_v44, %v1613_v44 }
 0x9a4   : > { %v1615_v46 = vsel %vm1608_vm13, %v1614_v21, 0.0 }
 0x9a5   : > { %1616 = vadd.xlane.f32.xlu0 %v1615_v46 }
 0xa18   : > { %v1617_v53 = vpop.xlane.xlu0 %1616 }
 0xa19   : > { %v1618_v54 = vmul.f32 %v1617_v53, %v2478_v12 }
 0xa1b   : > { %v1619_v56 = vadd.f32 1e-12, %v1618_v54 }
 0xa1d   : > { %2118 = vrsqrt.f32 %v1619_v56  ;;  %vm1626_vm15 = vweird.f32 %v1619_v56 }
 0xa23   : > { %v2119_v59 = vpop.eup %2118 }
 0xa24   : > { %v1621_v12 = vmul.f32 %v2119_v59, %v1619_v56  ;;  %vm1627_vm14 = vweird.f32 %v2119_v59 }
 0xa25   : > { %vm1628_vm0 = vmor %vm1626_vm15, %vm1627_vm14 }
 0xa26   : > { %v1622_v60 = vmul.f32 %v2119_v59, %v1621_v12 }
 0xa28   : > { %v1623_v61 = vmul.f32 0.5, %v1622_v60 }
 0xa2a   : > { %v1624_v62 = vsub.f32 1.5, %v1623_v61 }
 0xa2c   : > { %v1625_v63 = vmul.f32 %v2119_v59, %v1624_v62 }
 0xa2e   : > { %v1629_v1 = vsel %vm1628_vm0, %v2119_v59, %v1625_v63 }
 0xa2f   : > { %v1630_v3 = vmul.f32 %v1629_v1, %v1613_v44 }
 0xa31   : > { %v1631_v6 = vmul.f32 %v1630_v3, %v1606_v0 }
 0xa33   : > { %v1632_v8 = vadd.f32 %v1631_v6, %v1607_v5 }
 0xa35   : > { %1942 = vmatmul.msk.f32.vlgmr.msra.gmra.mxu0 %vm817_vm1, %v1632_v8  ;;  %vm1694_vm1 = vcmask 8192  }
 0xab2   : > { %v1658_v14 = vpop.f32.mrf.mxu0 }
 0xab3   : > { %v1659_v16 = vadd.f32 %v1658_v14, %v1637_v11 }
 0xab5   : > { %1943 = vmatmul.msk.f32.vlgmr.msra.gmra.mxu1 %vm1670_vm2, %v1659_v16 }
 0xb32   : > { %v1691_v18 = vpop.f32.mrf.mxu1 }
 0xb33   : > { %v1692_v42 = vadd.f32 %v1691_v18, %v1669_v17 }
 0xb35   : > { %1695 = vst.msk [vmem:[%s2467_s14] sm:$0x1] %vm1694_vm1, %v1692_v42 }
 0xb36 PF: > { %s2872_s20 = sld [smem:[#allocation9_spill]]  ;;  %s1707_s15 = sshll.u32 %s2467_s14, 4  ;;  %s1708_s15 = int_to_ptr.vmem [resolvable:$true] %s1707_s15 }
 0xb37   : > { %s2873_s13 = sld [smem:[#allocation28_spill]]  ;;  %s2875_s16 = sand.u32 1, %s2190_s30  }
 0xb38   : > { %s1697_s23 = scalar_lea.sflag [#allocation4], %s2875_s16 }
 0xb3d   : > { %s1705_s18 = scalar_lea.hbm %s2873_s13, %s2872_s20  ;;  %s2140_s28 = scalar_lea.hbm %s2873_s13, 2 }
 0xb3e   : > { %s1709_s22 = sshll.u32 %s1705_s18, 4  ;;  %s1710_s22 = int_to_ptr.hbm [resolvable:$true] %s1709_s22 }
 0xb3f   : > { %s2134_s21 = sshra.s32 %s1710_s22, 4  ;;  %s2135_s21 = int_to_ptr.hbm [resolvable:$true] %s2134_s21 }
 0xb40   : > { %s2136_s17 = scalar_lea.hbm %s2135_s21, 1  ;;  %p2141_p6 = scmp.lt.s32.totalorder %s2135_s21, %s2873_s13 }
 0xb41   : > { %p2137_p2 = scmp.ne.s32.totalorder %s2135_s21, %s2136_s17  ;;  %p2142_p7 = scmp.lt.s32.totalorder %s2140_s28, %s2136_s17 }
 0xb43   : > { %p2138_p4 = pnand %p2137_p2, %p2381_p3  ;;  %p2143_p8 = por %p2142_p7, %p2141_p6 }
 0xb45   : > { %p2139_p5 = pneg %p2138_p4 }
 0xb47   : > { %p2144_p10 = pnand %p2143_p8, %p2139_p5 }
 0xb49   : > { %2147 = shalt.err (!%p2144_p10)
}
 0xb4a   : > { %1953 = dma.vmem_to_hbm [thread:$0]  (%p2381_p3), %s1708_s15, 16, %s1710_s22, %s1697_s23  }
 0xb4b PF: > { %s2876_s14 = sld [smem:[#allocation12_spill]] }
 0xb4c   : > { %s2877_s19 = sld [smem:[#allocation6_spill]] }
 0xb51   : > { %p1959_p11 = scmp.ge.s32.totalorder %s2876_s14, 2 }
 0xb52   : > { %s1721_s1 = sand.u32 1, %s2877_s19  }
 0xb53   : > { %p1956_p12 = pnand %p1959_p11, %p2391_p9  ;;  %s1722_s27 = scalar_lea.sflag [#allocation4], %s1721_s1 }
 0xb55   : > { %p1957_p13 = pneg %p1956_p12 }
 0xb57   : > { %2181 = dma.done.wait (%p1957_p13), %s1722_s27, 16  }
 0xb58   : > { %2183 = vsyncadd (%p1957_p13), %s1722_s27, 4294967280  ;;  %s32_s23 = sadd.s32 1, %s2876_s14   ;;  %s2879_s18 = sld [smem:[#allocation7_spill]] }
 0xb59   : > { %p29_p0 = scmp.ge.s32.totalorder %s32_s23, 6   ;;  %s2880_s20 = sld [smem:[#allocation17_spill]] }
 0xb5a   : > { %s2881_s21 = sld [smem:[#allocation10_spill]]  ;;  %s2885_s0 = smov %s2190_s30 }
 0xb5b   : > { %s2882_s1 = sld [smem:[#allocation11_spill]]  ;;  %31 = sbr.rel (!%p29_p0) target bundleno = 17 (0x11), region = 175 }
 0xb5c   : > { %s2883_s22 = sld [smem:[#allocation13_spill]] }
 0xb5d   : > { %s2884_s2 = sld [smem:[#allocation15_spill]] }
 0xb5e   : > { %s2886_s30 = smov %s2879_s18 }
 0xb60   :  { %1727 = vsyncpa [#allocation4], 1 }
 0xb61   :  { %1729 = vsyncpa [#allocation4 + $0x1], 1 }

</bundles_post_ra>
